<compile_context>
chip_gen: v5e
topology: v5e:2x2
jax: 0.10.0
libtpu: 0.0.40
codegen_flags: <defaults>
</compile_context>

<pallas_src>
import functools

import jax
import jax.numpy as jnp
from jax.experimental import pallas as pl
from jax.experimental.pallas import tpu as pltpu


# ---------------------------------------------------------------------------
# Kernel
# ---------------------------------------------------------------------------
def _mf_v_kernel(apply_sigmoid, ue_ref, ie_ref, bias_ref, out_ref):
    # ue_ref, ie_ref : (tb//128, 128, D) VMEM (bf16 or f32)  - 128 rows/sublane-slab, D on lanes
    # bias_ref, out  : (tb//128, 128)    VMEM f32            - lane-dense per-row scalars
    ue = ue_ref[...].astype(jnp.float32)
    ie = ie_ref[...].astype(jnp.float32)
    # per-row dot product: VPU multiply + XLU lane reduction, f32 accumulation.
    r_ui = jnp.sum(ue * ie, axis=-1)                 # (tb//128, 128), lane-dense
    f_uit = r_ui + bias_ref[...]                     # fused b + b_u + b_i
    if apply_sigmoid:
        f_uit = 1.0 / (1.0 + jnp.exp(-f_uit))        # EUP exp + divide
    out_ref[...] = f_uit.astype(out_ref.dtype)


# ---------------------------------------------------------------------------
# Tiling helpers
# ---------------------------------------------------------------------------
def _round_up(x, m):
    return (x + m - 1) // m * m


def _vmem_budget_and_limit():
    """Per-generation VMEM working-set budget and scoped limit (bytes)."""
    try:
        cap = int(pltpu.get_tpu_info().vmem_capacity_bytes)
    except Exception:  # pragma: no cover - conservative fallback if query unavailable
        cap = 64 * 1024 * 1024                       # assume v7x-class (smallest VMEM)
    if cap >= 96 * 1024 * 1024:                      # v5e / v6e: 128 MiB physical
        budget = 40 * 1024 * 1024
    else:                                            # v7x: 64 MiB physical
        budget = 24 * 1024 * 1024
    limit = min(cap - 8 * 1024 * 1024, budget + 16 * 1024 * 1024)
    return budget, limit


def _choose_batch_tile(B, D, emb_bytes, vmem_budget):
    """Pick a batch tile (multiple of 128 rows) from a lane-padding-aware VMEM model."""
    b128 = _round_up(B, 128)
    lanes = _round_up(max(D, 1), 128)                # D < 128 blocks still occupy 128 lanes
    # Per-row VMEM bytes:
    #   double-buffered input/output blocks: 2 x (ue + ie + bias + out)
    #   + ~3 lane-padded f32 intermediates (two upcasts + product) materialized by Mosaic.
    per_row = 2 * (2 * lanes * emb_bytes + 4 + 4) + 3 * lanes * 4
    tb_cap = max(1024, (vmem_budget // per_row) // 1024 * 1024)
    tb_cap = min(tb_cap, 32768)
    if b128 <= 2048:
        return b128                                  # tiny problem: one grid step
    # Aim for >= ~8 grid steps (pipelining + both v7x TensorCores), but never below
    # 1024 rows so each step's DMA dwarfs the ~0.35 us per-step overhead.
    return min(tb_cap, max(1024, _round_up(pl.cdiv(b128, 8), 1024)))


# ---------------------------------------------------------------------------
# Forward wrapper
# ---------------------------------------------------------------------------
def mf_v_forward(user, item, params, *, apply_sigmoid=True, batch_tile=None,
                 embed_dtype=jnp.bfloat16, allow_input_fusion=False):
    """MF_v.forward: returns (B,) float32 scores (sigmoid applied when apply_sigmoid)."""
    B = user.shape[0]
    D = params["user_embedding"].shape[1]
    emb_bytes = jnp.dtype(embed_dtype).itemsize
    vmem_budget, vmem_limit = _vmem_budget_and_limit()

    # --- tile selection -----------------------------------------------------
    if batch_tile is None:
        tb = _choose_batch_tile(B, D, emb_bytes, vmem_budget)
    else:
        tb = max(128, _round_up(int(batch_tile), 128))
    b128 = _round_up(B, 128)
    tb = min(tb, b128)
    if tb < b128 and tb % 1024 != 0:
        # multi-step grids need (tb//128) % 8 == 0 for the (tb//128, 128) bias/out blocks
        tb = _round_up(tb, 1024)
    if tb >= b128:
        tb = b128                                    # single grid step covers everything
    b_pad = _round_up(B, tb)
    grid_steps = b_pad // tb

    # --- pad the *indices* (O(B)), never the gathered (B, D) arrays ----------
    pad = b_pad - B
    if pad:
        user = jnp.pad(user, (0, pad))               # index 0 is always valid
        item = jnp.pad(item, (0, pad))

    # --- gather + cast (glue: stays in XLA) ----------------------------------
    ue = params["user_embedding"][user].astype(embed_dtype)      # (b_pad, D)
    ie = params["item_embedding"][item].astype(embed_dtype)      # (b_pad, D)
    bias = (params["b"].astype(jnp.float32)[0]
            + params["b_u"][user][:, 0].astype(jnp.float32)
            + params["b_i"][item][:, 0].astype(jnp.float32))      # (b_pad,)

    # --- free reshapes into lane-dense layouts -------------------------------
    G = b_pad // 128                                 # rows-of-128 total
    gt = tb // 128                                   # rows-of-128 per tile
    ue3 = ue.reshape(G, 128, D)
    ie3 = ie.reshape(G, 128, D)
    bias2 = bias.reshape(G, 128)

    cp_kwargs = dict(
        # "parallel" only buys anything on multi-TensorCore chips (v7x); harmless elsewhere.
        dimension_semantics=("parallel",),
        vmem_limit_bytes=int(vmem_limit),
    )
    if allow_input_fusion:
        # Opt-in: let XLA fuse the gather/cast producers into the pallas_call inputs,
        # removing the HBM round-trip of the gathered rows.
        cp_kwargs["allow_input_fusion"] = [True, True, True]

    out = pl.pallas_call(
        functools.partial(_mf_v_kernel, apply_sigmoid),
        out_shape=jax.ShapeDtypeStruct((G, 128), jnp.float32),
        grid=(grid_steps,),
        in_specs=[
            pl.BlockSpec((gt, 128, D), lambda i: (i, 0, 0)),   # user_e tile
            pl.BlockSpec((gt, 128, D), lambda i: (i, 0, 0)),   # item_e tile
            pl.BlockSpec((gt, 128), lambda i: (i, 0)),         # fused bias tile (lane-dense)
        ],
        out_specs=pl.BlockSpec((gt, 128), lambda i: (i, 0)),   # lane-dense output
        compiler_params=pltpu.CompilerParams(**cp_kwargs),
    )(ue3, ie3, bias2)

    return out.reshape(-1)[:B]


# ---------------------------------------------------------------------------
# Parameter init + pure-JAX reference
# ---------------------------------------------------------------------------
def init_params(key, n_users, n_items, embedding_size):
    """Deterministic xavier_normal-style init (f32 master copy)."""
    k1, k2, k3, k4, k5 = jax.random.split(key, 5)

    def xavier_normal(k, shape):
        fan_in, fan_out = shape[0], shape[1]
        std = jnp.sqrt(2.0 / (fan_in + fan_out))
        return jax.random.normal(k, shape, dtype=jnp.float32) * std

    return {
        "user_embedding": xavier_normal(k1, (n_users, embedding_size)),
        "item_embedding": xavier_normal(k2, (n_items, embedding_size)),
        "b_u": xavier_normal(k3, (n_users, 1)),
        "b_i": xavier_normal(k4, (n_items, 1)),
        # self.b = Parameter(torch.Tensor(1)) is left uninitialized in the original
        # module; we init it deterministically here.
        "b": jax.random.normal(k5, (1,), dtype=jnp.float32) * 0.1,
    }


def mf_v_reference(user, item, params, *, apply_sigmoid=True):
    ue = params["user_embedding"][user].astype(jnp.float32)
    ie = params["item_embedding"][item].astype(jnp.float32)
    r_ui = jnp.sum(ue * ie, axis=-1)
    f = (r_ui + params["b"].astype(jnp.float32)[0]
         + params["b_u"][user][:, 0].astype(jnp.float32)
         + params["b_i"][item][:, 0].astype(jnp.float32))
    return jax.nn.sigmoid(f) if apply_sigmoid else f


# ---------------------------------------------------------------------------
# Demo / self-check
# ---------------------------------------------------------------------------
if __name__ == "__main__":
    n_users, n_items, embedding_size = 50, 64, 32
    key = jax.random.PRNGKey(0)
    kp, ku1, ki1, ku2, ki2 = jax.random.split(key, 5)

    params = init_params(kp, n_users, n_items, embedding_size)          # f32 master
    # Production config: embedding tables stored in bf16 (cast once, outside hot path).
    params_bf16 = dict(params)
    params_bf16["user_embedding"] = params["user_embedding"].astype(jnp.bfloat16)
    params_bf16["item_embedding"] = params["item_embedding"].astype(jnp.bfloat16)

    # --- small batch: single grid step, index-padded 200 -> 256, bf16 tables ---
    B1 = 200
    user1 = jax.random.randint(ku1, (B1,), 0, n_users, dtype=jnp.int32)
    item1 = jax.random.randint(ki1, (B1,), 0, n_items, dtype=jnp.int32)
    ref1 = mf_v_reference(user1, item1, params_bf16, apply_sigmoid=True)
    out1 = jax.block_until_ready(mf_v_forward(user1, item1, params_bf16,
                                              apply_sigmoid=True))
    assert out1.shape == (B1,) and out1.dtype == jnp.float32
    assert jnp.allclose(out1, ref1, atol=1e-5, rtol=1e-5), \
        float(jnp.max(jnp.abs(out1 - ref1)))

    # --- larger batch: multi-step grid (3000 -> 3072 rows, tb=1024, 3 steps), f32 ---
    B2 = 3000
    user2 = jax.random.randint(ku2, (B2,), 0, n_users, dtype=jnp.int32)
    item2 = jax.random.randint(ki2, (B2,), 0, n_items, dtype=jnp.int32)
    ref2 = mf_v_reference(user2, item2, params, apply_sigmoid=True)
    out2 = jax.block_until_ready(mf_v_forward(user2, item2, params, apply_sigmoid=True,
                                              batch_tile=1024, embed_dtype=jnp.float32))
    assert out2.shape == (B2,) and out2.dtype == jnp.float32
    assert jnp.allclose(out2, ref2, atol=1e-5, rtol=1e-5), \
        float(jnp.max(jnp.abs(out2 - ref2)))

    print("KERNEL_OK")
</pallas_src>

<mosaic_0001>
module attributes {stable_mosaic.version = 11 : i64} {
  func.func @_mf_v_kernel(%arg0: i32, %arg1: memref<2x128x32xbf16, #tpu.memory_space<vmem>>, %arg2: memref<2x128x32xbf16, #tpu.memory_space<vmem>>, %arg3: memref<2x128xf32, #tpu.memory_space<vmem>>, %arg4: memref<2x128xf32, #tpu.memory_space<vmem>>) attributes {dimension_semantics = [#tpu.dimension_semantics<parallel>], iteration_bounds = array<i64: 1>, scalar_prefetch = 0 : i64, scratch_operands = 0 : i64, tpu.core_type = #tpu.core_type<tc>, window_params = [{transform_indices = @transform_0, window_bounds = array<i64: 2, 128, 32>}, {transform_indices = @transform_1, window_bounds = array<i64: 2, 128, 32>}, {transform_indices = @transform_2, window_bounds = array<i64: 2, 128>}, {transform_indices = @transform_3, window_bounds = array<i64: 2, 128>}]} {
    %c0 = arith.constant 0 : index
    %c0_0 = arith.constant 0 : index
    %c0_1 = arith.constant 0 : index
    %0 = vector.load %arg1[%c0, %c0_0, %c0_1] : memref<2x128x32xbf16, #tpu.memory_space<vmem>>, vector<2x128x32xbf16>
    %1 = arith.extf %0 : vector<2x128x32xbf16> to vector<2x128x32xf32>
    %c0_2 = arith.constant 0 : index
    %c0_3 = arith.constant 0 : index
    %c0_4 = arith.constant 0 : index
    %2 = vector.load %arg2[%c0_2, %c0_3, %c0_4] : memref<2x128x32xbf16, #tpu.memory_space<vmem>>, vector<2x128x32xbf16>
    %3 = arith.extf %2 : vector<2x128x32xbf16> to vector<2x128x32xf32>
    %4 = arith.mulf %1, %3 : vector<2x128x32xf32>
    %cst = arith.constant dense<0.000000e+00> : vector<2x128xf32>
    %5 = vector.multi_reduction <add>, %4, %cst [2] : vector<2x128x32xf32> to vector<2x128xf32>
    %c0_5 = arith.constant 0 : index
    %c0_6 = arith.constant 0 : index
    %6 = vector.load %arg3[%c0_5, %c0_6] : memref<2x128xf32, #tpu.memory_space<vmem>>, vector<2x128xf32>
    %7 = arith.addf %5, %6 : vector<2x128xf32>
    %cst_7 = arith.constant 0.000000e+00 : f32
    %8 = vector.broadcast %cst_7 : f32 to vector<2x128xf32>
    %9 = arith.subf %8, %7 : vector<2x128xf32>
    %10 = math.exp %9 : vector<2x128xf32>
    %cst_8 = arith.constant 1.000000e+00 : f32
    %11 = vector.broadcast %cst_8 : f32 to vector<2x128xf32>
    %12 = arith.addf %11, %10 : vector<2x128xf32>
    %cst_9 = arith.constant 1.000000e+00 : f32
    %13 = vector.broadcast %cst_9 : f32 to vector<2x128xf32>
    %14 = arith.divf %13, %12 : vector<2x128xf32>
    %c0_10 = arith.constant 0 : index
    %c0_11 = arith.constant 0 : index
    %15 = vector.load %arg4[%c0_10, %c0_11] : memref<2x128xf32, #tpu.memory_space<vmem>>, vector<2x128xf32>
    tpu.vector_store %arg4[%c0_10, %c0_11], %14 {strides = array<i32>} : memref<2x128xf32, #tpu.memory_space<vmem>>, vector<2x128xf32>,
    return
  }
  func.func @transform_0(%arg0: i32) -> (i32, i32, i32) {
    %c0_i32 = arith.constant 0 : i32
    %c0_i32_0 = arith.constant 0 : i32
    %c0_i32_1 = arith.constant 0 : i32
    return %arg0, %c0_i32, %c0_i32_0 : i32, i32, i32
  }
  func.func @transform_1(%arg0: i32) -> (i32, i32, i32) {
    %c0_i32 = arith.constant 0 : i32
    %c0_i32_0 = arith.constant 0 : i32
    %c0_i32_1 = arith.constant 0 : i32
    return %arg0, %c0_i32, %c0_i32_0 : i32, i32, i32
  }
  func.func @transform_2(%arg0: i32) -> (i32, i32) {
    %c0_i32 = arith.constant 0 : i32
    %c0_i32_0 = arith.constant 0 : i32
    return %arg0, %c0_i32 : i32, i32
  }
  func.func @transform_3(%arg0: i32) -> (i32, i32) {
    %c0_i32 = arith.constant 0 : i32
    %c0_i32_0 = arith.constant 0 : i32
    return %arg0, %c0_i32 : i32, i32
  }
}

</mosaic_0001>

<bundles_post_ra>
// kernel: tpu_custom_call.1
= control target key start
LH: loop header
LB: loop body
LE: loop exit
PB: predicated region body
PF: predicated region fallthrough
CT: control target
= control target key end

     0   :  { %vm175_vm0 = vcmask 261120   ;;  %s2597_s0 = inlined_call_operand.vmem [shape: bf16[2,128,32], index: 0, kind: input, shape index: {}]   ;;  %s2598_s1 = inlined_call_operand.vmem [shape: bf16[2,128,32], index: 1, kind: input, shape index: {}]   ;;  %s2599_s2 = inlined_call_operand.vmem [shape: f32[2,128], index: 2, kind: input, shape index: {}]   ;;  %s2600_s3 = inlined_call_operand.hbm [shape: f32[2,128], index: 3, kind: output, shape index: {}]  }
   0x1   :  { %v1511_v0 = vld [vmem:[%s2597_s0 + $0x10] sm:$0xff]   ;;  %v1510_v2 = vld [vmem:[%s2597_s0 + $0x8] sm:$0xff]   ;;  %v1383_v7 = vld [vmem:[%s2597_s0] sm:$0xff]  }
   0x2   :  { %v1526_v1 = vld [vmem:[%s2598_s1 + $0x10] sm:$0xff]   ;;  %v1392_v3 = vunpack.c.l.bf16 %v1511_v0  ;;  %v1388_v5 = vunpack.c.l.bf16 %v1510_v2  ;;  %v1525_v6 = vld [vmem:[%s2598_s1 + $0x8] sm:$0xff]   ;;  %v1447_v8 = vld [vmem:[%s2598_s1] sm:$0xff]   ;;  %v1384_v10 = vunpack.c.l.bf16 %v1383_v7  ;;  %v1393_v12 = vunpack.c.h.bf16 %v1511_v0 }
   0x3   :  { %v1456_v4 = vunpack.c.l.bf16 %v1526_v1  ;;  %v1452_v9 = vunpack.c.l.bf16 %v1525_v6  ;;  %v1448_v11 = vunpack.c.l.bf16 %v1447_v8  ;;  %v1457_v14 = vunpack.c.h.bf16 %v1526_v1 }
   0x4   :  { %v1389_v15 = vunpack.c.h.bf16 %v1510_v2  ;;  %v1453_v16 = vunpack.c.h.bf16 %v1525_v6  ;;  %v1385_v19 = vunpack.c.h.bf16 %v1383_v7  ;;  %v1449_v20 = vunpack.c.h.bf16 %v1447_v8 }
   0x5   :  { %v147_v13 = vmul.f32 %v1456_v4, %v1392_v3  ;;  %v145_v17 = vmul.f32 %v1452_v9, %v1388_v5  ;;  %v143_v18 = vmul.f32 %v1448_v11, %v1384_v10 }
   0x7   :  { %v188_v21 = vsel %vm175_vm0, %v147_v13, 0.0 }
   0x8   :  { %8 = vsyncpa [#allocation3], 0  ;;  %189 = vadd.xlane.f32.xlu2 %v188_v21  ;;  %v182_v22 = vsel %vm175_vm0, %v145_v17, 0.0  ;;  %v176_v23 = vsel %vm175_vm0, %v143_v18, 0.0  ;;  %v148_v24 = vmul.f32 %v1457_v14, %v1393_v12  ;;  %v146_v25 = vmul.f32 %v1453_v16, %v1389_v15  ;;  %v1513_v26 = vld [vmem:[%s2597_s0 + $0x20] sm:$0xff]   ;;  %v1512_v29 = vld [vmem:[%s2597_s0 + $0x18] sm:$0xff]  }
   0x9   :  { %183 = vadd.xlane.f32.xlu1 %v182_v22  ;;  %177 = vadd.xlane.f32.xlu0 %v176_v23  ;;  %v144_v27 = vmul.f32 %v1449_v20, %v1385_v19  ;;  %v1528_v28 = vld [vmem:[%s2598_s1 + $0x20] sm:$0xff]   ;;  %v1527_v30 = vld [vmem:[%s2598_s1 + $0x18] sm:$0xff]   ;;  %v1400_v31 = vunpack.c.l.bf16 %v1513_v26  ;;  %v1397_v35 = vunpack.c.h.bf16 %v1512_v29  ;;  %v1396_v38 = vunpack.c.l.bf16 %v1512_v29  ;;  %v1514_v41 = vld [vmem:[%s2597_s0 + $0x28] sm:$0xff]   ;;  %s1373_s25 = sshll.u32 %s2600_s3, 4  ;;  %s1374_s25 = int_to_ptr.hbm [resolvable:$true] %s1373_s25 }
   0xa   :  { %v191_v32 = vsel %vm175_vm0, %v148_v24, 0.0  ;;  %v185_v33 = vsel %vm175_vm0, %v146_v25, 0.0  ;;  %v1464_v34 = vunpack.c.l.bf16 %v1528_v28  ;;  %v1461_v37 = vunpack.c.h.bf16 %v1527_v30  ;;  %v1529_v44 = vld [vmem:[%s2598_s1 + $0x28] sm:$0xff]   ;;  %v1516_v55 = vld [vmem:[%s2597_s0 + $0x38] sm:$0xff]   ;;  %v1515_v59 = vld [vmem:[%s2597_s0 + $0x30] sm:$0xff]  }
   0xb   :  { %v179_v36 = vsel %vm175_vm0, %v144_v27, 0.0  ;;  %v1460_v39 = vunpack.c.l.bf16 %v1527_v30  ;;  %v1405_v45 = vunpack.c.h.bf16 %v1514_v41  ;;  %v1469_v47 = vunpack.c.h.bf16 %v1529_v44  ;;  %v1531_v58 = vld [vmem:[%s2598_s1 + $0x38] sm:$0xff]   ;;  %v1530_v60 = vld [vmem:[%s2598_s1 + $0x30] sm:$0xff]   ;;  %v1517_v7 = vld [vmem:[%s2597_s0 + $0x40] sm:$0xff]  }
   0xc   :  { %v151_v40 = vmul.f32 %v1464_v34, %v1400_v31  ;;  %v150_v42 = vmul.f32 %v1461_v37, %v1397_v35  ;;  %v1404_v48 = vunpack.c.l.bf16 %v1514_v41  ;;  %v1468_v49 = vunpack.c.l.bf16 %v1529_v44  ;;  %v1532_v10 = vld [vmem:[%s2598_s1 + $0x40] sm:$0xff]   ;;  %v1519_v21 = vld [vmem:[%s2597_s0 + $0x50] sm:$0xff]   ;;  %v1518_v25 = vld [vmem:[%s2597_s0 + $0x48] sm:$0xff]  }
   0xd   :  { %v149_v43 = vmul.f32 %v1460_v39, %v1396_v38  ;;  %v1401_v52 = vunpack.c.h.bf16 %v1513_v26  ;;  %v1465_v53 = vunpack.c.h.bf16 %v1528_v28  ;;  %v154_v54 = vmul.f32 %v1469_v47, %v1405_v45  ;;  %v1534_v22 = vld [vmem:[%s2598_s1 + $0x50] sm:$0xff]   ;;  %v1533_v26 = vld [vmem:[%s2598_s1 + $0x48] sm:$0xff]   ;;  %v1520_v37 = vld [vmem:[%s2597_s0 + $0x58] sm:$0xff]  }
   0xe   :  { %v200_v46 = vsel %vm175_vm0, %v151_v40, 0.0  ;;  %v197_v50 = vsel %vm175_vm0, %v150_v42, 0.0  ;;  %v153_v56 = vmul.f32 %v1468_v49, %v1404_v48  ;;  %v1412_v61 = vunpack.c.l.bf16 %v1516_v55  ;;  %v1535_v38 = vld [vmem:[%s2598_s1 + $0x58] sm:$0xff]  }
   0xf   :  { %v194_v51 = vsel %vm175_vm0, %v149_v43, 0.0  ;;  %v152_v57 = vmul.f32 %v1465_v53, %v1401_v52  ;;  %v209_v62 = vsel %vm175_vm0, %v154_v54, 0.0  ;;  %v1476_v63 = vunpack.c.l.bf16 %v1531_v58  ;;  %v1522_v53 = vld [vmem:[%s2597_s0 + $0x68] sm:$0xff]  }
  0x10   :  { %192 = vadd.xlane.f32.xlu2 %v191_v32  ;;  %v1409_v0 = vunpack.c.h.bf16 %v1515_v59  ;;  %v1473_v1 = vunpack.c.h.bf16 %v1530_v60  ;;  %v206_v2 = vsel %vm175_vm0, %v153_v56, 0.0  ;;  %v1408_v4 = vunpack.c.l.bf16 %v1515_v59  ;;  %v1537_v54 = vld [vmem:[%s2598_s1 + $0x68] sm:$0xff]   ;;  %v1521_v56 = vld [vmem:[%s2597_s0 + $0x60] sm:$0xff]  }
  0x11   :  { %186 = vadd.xlane.f32.xlu1 %v185_v33  ;;  %180 = vadd.xlane.f32.xlu0 %v179_v36  ;;  %v203_v3 = vsel %vm175_vm0, %v152_v57, 0.0  ;;  %v1472_v5 = vunpack.c.l.bf16 %v1530_v60  ;;  %v157_v6 = vmul.f32 %v1476_v63, %v1412_v61  ;;  %v1417_v11 = vunpack.c.h.bf16 %v1517_v7  ;;  %v1536_v57 = vld [vmem:[%s2598_s1 + $0x60] sm:$0xff]  }
  0x12   :  { %v156_v8 = vmul.f32 %v1473_v1, %v1409_v0  ;;  %v1481_v13 = vunpack.c.h.bf16 %v1532_v10  ;;  %v1416_v14 = vunpack.c.l.bf16 %v1517_v7  ;;  %v1480_v15 = vunpack.c.l.bf16 %v1532_v10  ;;  %v1538_v7 = vld [vmem:[%s2598_s1 + $0x70] sm:$0xff]  }
  0x13   :  { %v155_v9 = vmul.f32 %v1472_v5, %v1408_v4  ;;  %v218_v12 = vsel %vm175_vm0, %v157_v6, 0.0  ;;  %v1413_v18 = vunpack.c.h.bf16 %v1516_v55  ;;  %v1477_v19 = vunpack.c.h.bf16 %v1531_v58  ;;  %v1523_v6 = vld [vmem:[%s2597_s0 + $0x70] sm:$0xff]  }
  0x14   :  { %v215_v16 = vsel %vm175_vm0, %v156_v8, 0.0  ;;  %v160_v20 = vmul.f32 %v1481_v13, %v1417_v11  ;;  %v159_v23 = vmul.f32 %v1480_v15, %v1416_v14  ;;  %v1424_v27 = vunpack.c.l.bf16 %v1519_v21 }
  0x15   :  { %v212_v17 = vsel %vm175_vm0, %v155_v9, 0.0  ;;  %v158_v24 = vmul.f32 %v1477_v19, %v1413_v18  ;;  %v1488_v28 = vunpack.c.l.bf16 %v1534_v22  ;;  %v1421_v30 = vunpack.c.h.bf16 %v1518_v25 }
  0x16   :  { %v227_v29 = vsel %vm175_vm0, %v160_v20, 0.0  ;;  %v1485_v31 = vunpack.c.h.bf16 %v1533_v26  ;;  %v224_v32 = vsel %vm175_vm0, %v159_v23, 0.0  ;;  %v1420_v34 = vunpack.c.l.bf16 %v1518_v25  ;;  %v1524_v23 = vld [vmem:[%s2597_s0 + $0x78] sm:$0xff]  }
  0x17   :  { %v221_v33 = vsel %vm175_vm0, %v158_v24, 0.0  ;;  %v1484_v35 = vunpack.c.l.bf16 %v1533_v26  ;;  %v163_v36 = vmul.f32 %v1488_v28, %v1424_v27  ;;  %v1429_v42 = vunpack.c.h.bf16 %v1520_v37  ;;  %v1539_v24 = vld [vmem:[%s2598_s1 + $0x78] sm:$0xff]  }
  0x18   :  { %201 = vadd.xlane.f32.xlu2 %v200_v46  ;;  %v162_v39 = vmul.f32 %v1485_v31, %v1421_v30  ;;  %v1493_v43 = vunpack.c.h.bf16 %v1535_v38  ;;  %v1428_v44 = vunpack.c.l.bf16 %v1520_v37  ;;  %v1492_v45 = vunpack.c.l.bf16 %v1535_v38 }
  0x19   :  { %198 = vadd.xlane.f32.xlu1 %v197_v50  ;;  %195 = vadd.xlane.f32.xlu0 %v194_v51  ;;  %v161_v40 = vmul.f32 %v1484_v35, %v1420_v34  ;;  %v236_v41 = vsel %vm175_vm0, %v163_v36, 0.0  ;;  %v1425_v46 = vunpack.c.h.bf16 %v1519_v21  ;;  %v1489_v47 = vunpack.c.h.bf16 %v1534_v22  ;;  %v272_v36 = vld [vmem:[%s2599_s2] sm:$0x3]  ;;  %s1732_s2 = smov [#allocation2]  }
  0x1a   :  { %v233_v48 = vsel %vm175_vm0, %v162_v39, 0.0  ;;  %v166_v50 = vmul.f32 %v1493_v43, %v1429_v42  ;;  %v165_v51 = vmul.f32 %v1492_v45, %v1428_v44  ;;  %v275_v55 = vlaneseq  ;;  %s1371_s22 = sshll.u32 %s1732_s2, 4  ;;  %s1372_s22 = int_to_ptr.vmem [resolvable:$true] %s1371_s22 }
  0x1b   :  { %v230_v49 = vsel %vm175_vm0, %v161_v40, 0.0  ;;  %v164_v52 = vmul.f32 %v1489_v47, %v1425_v46  ;;  %v1436_v59 = vunpack.c.l.bf16 %v1522_v53  ;;  %v1500_v60 = vunpack.c.l.bf16 %v1537_v54 }
  0x1c   :  { %v1859_v58 = vshrl.u32 %v275_v55, 7  ;;  %v245_v61 = vsel %vm175_vm0, %v166_v50, 0.0  ;;  %v1433_v1 = vunpack.c.h.bf16 %v1521_v56  ;;  %v1496_v4 = vunpack.c.l.bf16 %v1536_v57 }
  0x1d   :  { %v239_v63 = vsel %vm175_vm0, %v164_v52, 0.0  ;;  %v169_v5 = vmul.f32 %v1500_v60, %v1436_v59  ;;  %v1441_v11 = vunpack.c.h.bf16 %v1523_v6  ;;  %v1440_v13 = vunpack.c.l.bf16 %v1523_v6 }
  0x1e   :  { %1542 = vset.pattern.permute.xlu2 %v1859_v58  ;;  %v1866_v0 = vadd.s32 8, %v1859_v58  ;;  %v1504_v14 = vunpack.c.l.bf16 %v1538_v7  ;;  %v1437_v15 = vunpack.c.h.bf16 %v1522_v53  ;;  %v289_v19 = vadd.s32 16, %v1859_v58 }
  0x1f   :  { %v254_v10 = vsel %vm175_vm0, %v169_v5, 0.0  ;;  %v1445_v28 = vunpack.c.h.bf16 %v1524_v23  ;;  %v1444_v30 = vunpack.c.l.bf16 %v1524_v23  ;;  %v1508_v31 = vunpack.c.l.bf16 %v1539_v24 }
  0x20   :  { %210 = vadd.xlane.f32.xlu2 %v209_v62  ;;  %v242_v62 = vsel %vm175_vm0, %v165_v51, 0.0  ;;  %1543 = vset.pattern.permute.xlu0 %v1866_v0  ;;  %v171_v21 = vmul.f32 %v1504_v14, %v1440_v13  ;;  %v1893_v37 = vperm.slane %v272_v36, 0  ;;  %v1897_v38 = vadd.s32 24, %v1859_v58 }
  0x21   :  { %207 = vadd.xlane.f32.xlu1 %v206_v2  ;;  %204 = vadd.xlane.f32.xlu0 %v203_v3  ;;  %v1497_v2 = vunpack.c.h.bf16 %v1536_v57  ;;  %v1432_v3 = vunpack.c.l.bf16 %v1521_v56  ;;  %v1902_v39 = vadd.s32 64, %v1859_v58  ;;  %v1907_v40 = vadd.s32 40, %v1859_v58 }
  0x22   :  { %1544 = vset.pattern.permute.xlu1 %v289_v19  ;;  %v260_v26 = vsel %vm175_vm0, %v171_v21, 0.0  ;;  %v1914_v42 = vadd.s32 32, %v1859_v58  ;;  %v1921_v44 = vadd.s32 104, %v1859_v58  ;;  %v319_v47 = vadd.s32 56, %v1859_v58 }
  0x23   :  { %v168_v8 = vmul.f32 %v1497_v2, %v1433_v1  ;;  %v167_v9 = vmul.f32 %v1496_v4, %v1432_v3  ;;  %v1953_v57 = vperm.slane %v272_v36, 1  ;;  %v1959_v60 = vadd.s32 72, %v1859_v58 }
  0x24   :  { %v349_v2 = vadd.s32 96, %v1859_v58  ;;  %v1977_v4 = vadd.s32 88, %v1859_v58 }
  0x25   :  { %v248_v18 = vsel %vm175_vm0, %v167_v9, 0.0 }
  0x28   :  { %219 = vadd.xlane.f32.xlu2 %v218_v12  ;;  %v1505_v12 = vunpack.c.h.bf16 %v1538_v7 }
  0x29   :  { %216 = vadd.xlane.f32.xlu1 %v215_v16  ;;  %213 = vadd.xlane.f32.xlu0 %v212_v17  ;;  %v1501_v16 = vunpack.c.h.bf16 %v1537_v54  ;;  %v251_v17 = vsel %vm175_vm0, %v168_v8, 0.0  ;;  %v1948_v54 = vadd.s32 80, %v1859_v58  ;;  %v1989_v8 = vadd.s32 120, %v1859_v58 }
  0x2a   :  { %v172_v20 = vmul.f32 %v1505_v12, %v1441_v11  ;;  %v1998_v11 = vadd.s32 112, %v1859_v58 }
  0x2b   :  { %v170_v22 = vmul.f32 %v1501_v16, %v1437_v15 }
  0x2c   :  { %v263_v25 = vsel %vm175_vm0, %v172_v20, 0.0 }
  0x2d   :  { %v257_v27 = vsel %vm175_vm0, %v170_v22, 0.0  ;;  %v1731_v22 = vmov 0  }
  0x30   :  { %228 = vadd.xlane.f32.xlu2 %v227_v29  ;;  %v1509_v29 = vunpack.c.h.bf16 %v1539_v24 }
  0x31   :  { %225 = vadd.xlane.f32.xlu1 %v224_v32  ;;  %222 = vadd.xlane.f32.xlu0 %v221_v33  ;;  %v173_v33 = vmul.f32 %v1508_v31, %v1444_v30 }
  0x32   :  { %v174_v32 = vmul.f32 %v1509_v29, %v1445_v28 }
  0x33   :  { %v266_v35 = vsel %vm175_vm0, %v173_v33, 0.0 }
  0x34   :  { %v269_v34 = vsel %vm175_vm0, %v174_v32, 0.0 }
  0x38   :  { %237 = vadd.xlane.f32.xlu2 %v236_v41 }
  0x39   :  { %234 = vadd.xlane.f32.xlu1 %v233_v48  ;;  %231 = vadd.xlane.f32.xlu0 %v230_v49  ;;  %v1934_v49 = vadd.s32 48, %v1859_v58 }
  0x40   :  { %246 = vadd.xlane.f32.xlu2 %v245_v61 }
  0x41   :  { %243 = vadd.xlane.f32.xlu1 %v242_v62  ;;  %240 = vadd.xlane.f32.xlu0 %v239_v63 }
  0x48   :  { %255 = vadd.xlane.f32.xlu2 %v254_v10 }
  0x49   :  { %252 = vadd.xlane.f32.xlu1 %v251_v17  ;;  %249 = vadd.xlane.f32.xlu0 %v248_v18 }
  0x50   :  { %264 = vadd.xlane.f32.xlu2 %v263_v25 }
  0x51   :  { %261 = vadd.xlane.f32.xlu1 %v260_v26  ;;  %258 = vadd.xlane.f32.xlu0 %v257_v27 }
  0x59   :  { %270 = vadd.xlane.f32.xlu1 %v269_v34  ;;  %267 = vadd.xlane.f32.xlu0 %v266_v35 }
  0x68   :  { %279 = vperm.xlu2 %1542, %v1893_v37  }
  0x6d   :  { %285 = vperm.xlu0 %1543, %v1893_v37  }
  0x70   :  { %1545 = vset.pattern.permute.xlu2 %v1897_v38 }
  0x72   :  { %291 = vperm.xlu1 %1544, %v1893_v37  }
  0x75   :  { %1550 = vset.pattern.permute.xlu0 %v1902_v39 }
  0x78   :  { %297 = vperm.xlu2 %1545, %v1893_v37  }
  0x7a   :  { %1547 = vset.pattern.permute.xlu1 %v1907_v40 }
  0x7b   :  { %v1911_v41 = vpop.xlane.xlu2 %189 }
  0x7c   :  { %v1916_v43 = vpop.xlane.xlu0 %177  ;;  %v1939_v51 = vpop.xlane.xlu1 %183 }
  0x7d   :  { %327 = vperm.xlu0 %1550, %v1893_v37  }
  0x80   :  { %1546 = vset.pattern.permute.xlu2 %v1914_v42 }
  0x82   :  { %309 = vperm.xlu1 %1547, %v1893_v37  }
  0x83   :  { %v1924_v45 = vpop.xlane.xlu2 %192 }
  0x84   :  { %v1926_v46 = vpop.xlane.xlu0 %180  ;;  %v1950_v56 = vpop.xlane.xlu1 %186 }
  0x85   :  { %1555 = vset.pattern.permute.xlu0 %v1921_v44 }
  0x88   :  { %303 = vperm.xlu2 %1546, %v1893_v37  }
  0x8a   :  { %1549 = vset.pattern.permute.xlu1 %v319_v47 }
  0x8b   :  { %v1931_v48 = vpop.xlane.xlu2 %201 }
  0x8c   :  { %v1936_v50 = vpop.xlane.xlu0 %195  ;;  %v1965_v62 = vpop.xlane.xlu1 %198 }
  0x8d   :  { %357 = vperm.xlu0 %1555, %v1893_v37  }
  0x90   :  { %1548 = vset.pattern.permute.xlu2 %v1934_v49 }
  0x92   :  { %321 = vperm.xlu1 %1549, %v1893_v37  }
  0x93   :  { %v1943_v52 = vpop.xlane.xlu2 %210 }
  0x94   :  { %v1945_v53 = vpop.xlane.xlu0 %204  ;;  %v1974_v3 = vpop.xlane.xlu1 %207 }
  0x95   :  { %1560 = vset.pattern.permute.xlu0 %v289_v19 }
  0x98   :  { %315 = vperm.xlu2 %1548, %v1893_v37  }
  0x9a   :  { %1552 = vset.pattern.permute.xlu1 %v1948_v54 }
  0x9b   :  { %v1956_v59 = vpop.xlane.xlu2 %219 }
  0x9c   :  { %v1961_v61 = vpop.xlane.xlu0 %213  ;;  %v1986_v7 = vpop.xlane.xlu1 %216 }
  0x9d   :  { %388 = vperm.xlu0 %1560, %v1953_v57  }
  0xa0   :  { %1551 = vset.pattern.permute.xlu2 %v1959_v60 }
  0xa2   :  { %339 = vperm.xlu1 %1552, %v1893_v37  }
  0xa3   :  { %v1970_v1 = vpop.xlane.xlu2 %228 }
  0xa4   :  { %v1968_v63 = vpop.xlane.xlu0 %222  ;;  %v2001_v12 = vpop.xlane.xlu1 %225 }
  0xa5   :  { %1565 = vset.pattern.permute.xlu0 %v319_v47 }
  0xa8   :  { %333 = vperm.xlu2 %1551, %v1893_v37  }
  0xaa   :  { %1554 = vset.pattern.permute.xlu1 %v349_v2 }
  0xab   :  { %v1982_v6 = vpop.xlane.xlu2 %237 }
  0xac   :  { %v1980_v5 = vpop.xlane.xlu0 %231  ;;  %v2010_v15 = vpop.xlane.xlu1 %234 }
  0xad   :  { %418 = vperm.xlu0 %1565, %v1953_v57  }
  0xb0   :  { %1553 = vset.pattern.permute.xlu2 %v1977_v4 }
  0xb2   :  { %351 = vperm.xlu1 %1554, %v1893_v37  }
  0xb3   :  { %v1994_v10 = vpop.xlane.xlu2 %246 }
  0xb4   :  { %v1991_v9 = vpop.xlane.xlu0 %240  ;;  %v2019_v18 = vpop.xlane.xlu1 %243 }
  0xb5   :  { %1570 = vset.pattern.permute.xlu0 %v349_v2 }
  0xb8   :  { %345 = vperm.xlu2 %1553, %v1893_v37  }
  0xba   :  { %1557 = vset.pattern.permute.xlu1 %v1989_v8 }
  0xbb   :  { %v2007_v14 = vpop.xlane.xlu2 %255 }
  0xbc   :  { %v2004_v13 = vpop.xlane.xlu0 %249  ;;  %v2025_v21 = vpop.xlane.xlu1 %252 }
  0xbd   :  { %448 = vperm.xlu0 %1570, %v1953_v57  }
  0xc0   :  { %1556 = vset.pattern.permute.xlu2 %v1998_v11 }
  0xc2   :  { %369 = vperm.xlu1 %1557, %v1893_v37  }
  0xc3   :  { %v2015_v17 = vpop.xlane.xlu2 %264 }
  0xc4   :  { %v2013_v16 = vpop.xlane.xlu0 %258  ;;  %v2031_v26 = vpop.xlane.xlu1 %261 }
  0xc5   :  { %1575 = vset.pattern.permute.xlu0 %v1731_v22 }
  0xc8   :  { %363 = vperm.xlu2 %1556, %v1893_v37  }
  0xca   :  { %1559 = vset.pattern.permute.xlu1 %v1866_v0 }
  0xcb   :  { %v280_v20 = vpop.permute.xlu2 %279 }
  0xcc   :  { %v2021_v19 = vpop.xlane.xlu0 %267  ;;  %v2036_v30 = vpop.xlane.xlu1 %270  ;;  %v500_v32 = vadd.f32 %v280_v20, %v1916_v43 }
  0xd0   :  { %1558 = vset.pattern.permute.xlu2 %v1859_v58 }
  0xd2   :  { %382 = vperm.xlu1 %1559, %v1953_v57  }
  0xd3   :  { %v298_v58 = vpop.permute.xlu2 %297 }
  0xd4   :  { %v503_v35 = vadd.f32 %v298_v58, %v1950_v56 }
  0xd8   :  { %376 = vperm.xlu2 %1558, %v1953_v57  }
  0xda   :  { %1562 = vset.pattern.permute.xlu1 %v1914_v42 }
  0xdf   :  { %v286_v0 = vpop.permute.xlu0 %285 }
  0xe0   :  { %v501_v23 = vadd.f32 %v286_v0, %v1926_v46  ;;  %1561 = vset.pattern.permute.xlu2 %v1897_v38  ;;  %v532_v38 = vsub.f32 0.0, %v500_v32 }
  0xe2   :  { %v533_v24 = vsub.f32 0.0, %v501_v23  ;;  %400 = vperm.xlu1 %1562, %v1953_v57   ;;  %v304_v27 = vpop.permute.xlu2 %303 }
  0xe4   :  { %v566_v25 = vmul.f32 1.442695, %v533_v24 }
  0xe6   :  { %1577 = vpow2.f32 %v566_v25 }
  0xe8   :  { %394 = vperm.xlu2 %1561, %v1953_v57  }
  0xea   :  { %1564 = vset.pattern.permute.xlu1 %v1934_v49  ;;  %v292_v49 = vpop.permute.xlu1 %291 }
  0xeb   :  { %v502_v32 = vadd.f32 %v292_v49, %v1939_v51 }
  0xec   :  { %v1578_v28 = vpop.eup %1577 }
  0xed   :  { %v629_v29 = vadd.f32 1.0, %v1578_v28 }
  0xef   :  { %1579 = vrcp.f32 %v629_v29  ;;  %v686_v47 = vand.u32 2147483648, %v629_v29  ;;  %vm680_vm1 = vweird.f32 %v629_v29  ;;  %v684_v43 = vand.u32 2147483647, %v629_v29 }
  0xf0   :  { %1563 = vset.pattern.permute.xlu2 %v1907_v40  ;;  %v535_v40 = vsub.f32 0.0, %v503_v35 }
  0xf1   :  { %v687_v0 = vor.u32 1.1754944e-38, %v686_v47  ;;  %vm685_vm4 = vcmp.eq.f32.partialorder %v684_v43, 8.507059e+37 }
  0xf2   :  { %412 = vperm.xlu1 %1564, %v1953_v57   ;;  %v316_v31 = vpop.permute.xlu2 %315  ;;  %v570_v56 = vmul.f32 1.442695, %v535_v40  ;;  %v534_v40 = vsub.f32 0.0, %v502_v32 }
  0xf3   :  { %v506_v33 = vadd.f32 %v316_v31, %v1936_v50  ;;  %v564_v50 = vmul.f32 1.442695, %v532_v38 }
  0xf4   :  { %v568_v49 = vmul.f32 1.442695, %v534_v40 }
  0xf5   :  { %v1580_v34 = vpop.eup %1579  ;;  %v538_v36 = vsub.f32 0.0, %v506_v33 }
  0xf6   :  { %v676_v37 = vmul.f32 %v1580_v34, %v629_v29  ;;  %vm681_vm2 = vweird.f32 %v1580_v34  ;;  %v504_v29 = vadd.f32 %v304_v27, %v1911_v41 }
  0xf7   :  { %v576_v42 = vmul.f32 1.442695, %v538_v36  ;;  %vm682_vm3 = vmor %vm680_vm1, %vm681_vm2 }
  0xf8   :  { %406 = vperm.xlu2 %1563, %v1953_v57   ;;  %v677_v46 = vsub.f32 1.0, %v676_v37  ;;  %v536_v38 = vsub.f32 0.0, %v504_v29 }
  0xf9   :  { %1581 = vpow2.f32 %v576_v42 }
  0xfa   :  { %1567 = vset.pattern.permute.xlu1 %v1959_v60  ;;  %v678_v2 = vmul.f32 %v1580_v34, %v677_v46  ;;  %1583 = vpow2.f32 %v564_v50  ;;  %v310_v60 = vpop.permute.xlu1 %309 }
  0xfb   :  { %1585 = vpow2.f32 %v570_v56  ;;  %v505_v35 = vadd.f32 %v310_v60, %v1924_v45  ;;  %v572_v45 = vmul.f32 1.442695, %v536_v38 }
  0xfc   :  { %v679_v20 = vadd.f32 %v1580_v34, %v678_v2 }
  0xfd   :  { %v537_v41 = vsub.f32 0.0, %v505_v35 }
  0xfe   :  { %v683_v23 = vsel %vm682_vm3, %v1580_v34, %v679_v20  ;;  %v328_v34 = vpop.permute.xlu0 %327 }
  0xff   :  { %v1582_v58 = vpop.eup %1581  ;;  %v688_v24 = vsel %vm685_vm4, %v687_v0, %v683_v23  ;;  %v508_v47 = vadd.f32 %v328_v34, %v1931_v48  ;;  %v574_v50 = vmul.f32 1.442695, %v537_v41 }
 0x100   :  { %v634_v25 = vadd.f32 1.0, %v1582_v58  ;;  %1176 = vperm.xlu0 %1575, %v688_v24   ;;  %1566 = vset.pattern.permute.xlu2 %v1902_v39  ;;  %v1584_v33 = vpop.eup %1583 }
 0x101   :  { %v1586_v37 = vpop.eup %1585  ;;  %v2050_v46 = vadd.f32 1.0, %v1584_v33  ;;  %v540_v2 = vsub.f32 0.0, %v508_v47 }
 0x102   :  { %1587 = vrcp.f32 %v634_v25  ;;  %430 = vperm.xlu1 %1567, %v1953_v57   ;;  %v334_v28 = vpop.permute.xlu2 %333  ;;  %v2054_v51 = vadd.f32 1.0, %v1586_v37  ;;  %v761_v43 = vand.u32 2147483648, %v634_v25  ;;  %v759_v48 = vand.u32 2147483647, %v634_v25 }
 0x103   :  { %v509_v31 = vadd.f32 %v334_v28, %v1945_v53  ;;  %vm755_vm6 = vweird.f32 %v634_v25  ;;  %v580_v23 = vmul.f32 1.442695, %v540_v2  ;;  %vm665_vm9 = vweird.f32 %v2050_v46 }
 0x104   :  { %v762_v58 = vor.u32 1.1754944e-38, %v761_v43  ;;  %vm760_vm8 = vcmp.eq.f32.partialorder %v759_v48, 8.507059e+37  ;;  %vm710_vm2 = vweird.f32 %v2054_v51 }
 0x105   :  { %v541_v36 = vsub.f32 0.0, %v509_v31 }
 0x106   :  { %v358_v41 = vpop.permute.xlu0 %357 }
 0x107   :  { %v582_v39 = vmul.f32 1.442695, %v541_v36  ;;  %v513_v48 = vadd.f32 %v358_v41, %v1986_v7 }
 0x108   :  { %v1588_v42 = vpop.eup %1587  ;;  %424 = vperm.xlu2 %1566, %v1953_v57  }
 0x109   :  { %1589 = vpow2.f32 %v582_v39  ;;  %v751_v53 = vmul.f32 %v1588_v42, %v634_v25  ;;  %vm756_vm5 = vweird.f32 %v1588_v42  ;;  %v322_v25 = vpop.permute.xlu1 %321 }
 0x10a   :  { %1569 = vset.pattern.permute.xlu1 %v1977_v4  ;;  %1591 = vrcp.f32 %v2050_v46  ;;  %vm757_vm7 = vmor %vm755_vm6, %vm756_vm5  ;;  %v507_v36 = vadd.f32 %v322_v25, %v1965_v62 }
 0x10b   :  { %v752_v27 = vsub.f32 1.0, %v751_v53  ;;  %1593 = vrcp.f32 %v2054_v51 }
 0x10c   :  { %1595 = vpow2.f32 %v572_v45  ;;  %v539_v62 = vsub.f32 0.0, %v507_v36 }
 0x10d   :  { %v753_v20 = vmul.f32 %v1588_v42, %v752_v27  ;;  %1597 = vpow2.f32 %v568_v49 }
 0x10e   :  { %1599 = vpow2.f32 %v574_v50 }
 0x10f   :  { %v1590_v56 = vpop.eup %1589  ;;  %v754_v0 = vadd.f32 %v1588_v42, %v753_v20 }
 0x110   :  { %v637_v4 = vadd.f32 1.0, %v1590_v56  ;;  %1568 = vset.pattern.permute.xlu2 %v1948_v54  ;;  %v2060_v60 = vpop.eup %1591 }
 0x111   :  { %v758_v24 = vsel %vm757_vm7, %v1588_v42, %v754_v0  ;;  %v2063_v31 = vpop.eup %1593  ;;  %v661_v34 = vmul.f32 %v2060_v60, %v2050_v46  ;;  %vm666_vm14 = vweird.f32 %v2060_v60 }
 0x112   :  { %1601 = vrcp.f32 %v637_v4  ;;  %442 = vperm.xlu1 %1569, %v1953_v57   ;;  %v346_v28 = vpop.permute.xlu2 %345  ;;  %v763_v29 = vsel %vm760_vm8, %v762_v58, %v758_v24  ;;  %v1596_v54 = vpop.eup %1595  ;;  %v706_v53 = vmul.f32 %v2063_v31, %v2054_v51  ;;  %v806_v43 = vand.u32 2147483648, %v637_v4  ;;  %vm2113_vm0 = vmor %vm665_vm9, %vm666_vm14 }
 0x113   :  { %1191 = vperm.xlu0 %1575, %v763_v29   ;;  %1603 = vpow2.f32 %v580_v23  ;;  %v511_v32 = vadd.f32 %v346_v28, %v1943_v52  ;;  %v1598_v33 = vpop.eup %1597  ;;  %v2069_v38 = vadd.f32 1.0, %v1596_v54  ;;  %v662_v52 = vsub.f32 1.0, %v661_v34  ;;  %v389_v54 = vpop.permute.xlu0 %388 }
 0x114   :  { %v1600_v35 = vpop.eup %1599  ;;  %v2077_v45 = vadd.f32 1.0, %v1598_v33  ;;  %v340_v2 = vpop.permute.xlu1 %339  ;;  %v707_v0 = vsub.f32 1.0, %v706_v53  ;;  %v578_v23 = vmul.f32 1.442695, %v539_v62  ;;  %vm800_vm11 = vweird.f32 %v637_v4 }
 0x115   :  { %v543_v39 = vsub.f32 0.0, %v511_v32  ;;  %v2072_v47 = vadd.f32 1.0, %v1600_v35  ;;  %1605 = vrcp.f32 %v2069_v38  ;;  %v663_v56 = vmul.f32 %v2060_v60, %v662_v52 }
 0x116   :  { %v807_v24 = vor.u32 1.1754944e-38, %v806_v43  ;;  %v669_v28 = vand.u32 2147483647, %v2050_v46  ;;  %v671_v29 = vand.u32 2147483648, %v2050_v46  ;;  %v545_v32 = vsub.f32 0.0, %v513_v48 }
 0x117   :  { %v586_v49 = vmul.f32 1.442695, %v543_v39  ;;  %1607 = vrcp.f32 %v2072_v47  ;;  %v664_v33 = vadd.f32 %v2060_v60, %v663_v56  ;;  %v708_v34 = vmul.f32 %v2063_v31, %v707_v0 }
 0x118   :  { %v1602_v37 = vpop.eup %1601  ;;  %436 = vperm.xlu2 %1568, %v1953_v57   ;;  %1609 = vrcp.f32 %v2077_v45  ;;  %v510_v35 = vadd.f32 %v340_v2, %v1974_v3  ;;  %vm2101_vm15 = vcmp.eq.f32.partialorder %v669_v28, 8.507059e+37  ;;  %v518_v52 = vadd.f32 %v389_v54, %v1980_v5 }
 0x119   :  { %v796_v42 = vmul.f32 %v1602_v37, %v637_v4  ;;  %v1604_v40 = vpop.eup %1603  ;;  %vm801_vm10 = vweird.f32 %v1602_v37  ;;  %1611 = vpow2.f32 %v586_v49  ;;  %v714_v3 = vand.u32 2147483647, %v2054_v51 }
 0x11a   :  { %1572 = vset.pattern.permute.xlu1 %v1998_v11  ;;  %v2081_v50 = vadd.f32 1.0, %v1604_v40  ;;  %v804_v11 = vand.u32 2147483647, %v637_v4  ;;  %vm802_vm12 = vmor %vm800_vm11, %vm801_vm10  ;;  %v672_v40 = vor.u32 1.1754944e-38, %v671_v29  ;;  %v590_v49 = vmul.f32 1.442695, %v545_v32 }
 0x11b   :  { %v797_v27 = vsub.f32 1.0, %v796_v42  ;;  %v2092_v25 = vpop.eup %1605  ;;  %v668_v2 = vsel %vm2113_vm0, %v2060_v60, %v664_v33  ;;  %v709_v5 = vadd.f32 %v2063_v31, %v708_v34  ;;  %vm711_vm1 = vweird.f32 %v2063_v31 }
 0x11c   :  { %1613 = vrcp.f32 %v2081_v50  ;;  %vm805_vm13 = vcmp.eq.f32.partialorder %v804_v11, 8.507059e+37  ;;  %v542_v43 = vsub.f32 0.0, %v510_v35  ;;  %v716_v48 = vand.u32 2147483648, %v2054_v51  ;;  %vm2141_vm3 = vmor %vm710_vm2, %vm711_vm1 }
 0x11d   :  { %v798_v20 = vmul.f32 %v1602_v37, %v797_v27  ;;  %1615 = vpow2.f32 %v578_v23  ;;  %v721_v56 = vmul.f32 %v2092_v25, %v2069_v38  ;;  %v550_v23 = vsub.f32 0.0, %v518_v52 }
 0x11e   :  { %v673_v28 = vsel %vm2101_vm15, %v672_v40, %v668_v2  ;;  %vm715_vm4 = vcmp.eq.f32.partialorder %v714_v3, 8.507059e+37  ;;  %v713_v32 = vsel %vm2141_vm3, %v2063_v31, %v709_v5  ;;  %v701_v34 = vand.u32 2147483648, %v2077_v45 }
 0x11f   :  { %v799_v58 = vadd.f32 %v1602_v37, %v798_v20  ;;  %v600_v35 = vmul.f32 1.442695, %v550_v23  ;;  %v729_v52 = vand.u32 2147483647, %v2069_v38  ;;  %vm695_vm5 = vweird.f32 %v2077_v45 }
 0x120   :  { %1571 = vset.pattern.permute.xlu2 %v1921_v44  ;;  %vm725_vm6 = vweird.f32 %v2069_v38  ;;  %vm726_vm7 = vweird.f32 %v2092_v25  ;;  %vm785_vm9 = vweird.f32 %v2081_v50  ;;  %v791_v51 = vand.u32 2147483648, %v2081_v50 }
 0x121   :  { %v803_v7 = vsel %vm802_vm12, %v1602_v37, %v799_v58  ;;  %v2099_v37 = vpop.eup %1607  ;;  %vm740_vm12 = vweird.f32 %v2072_v47  ;;  %vm2229_vm0 = vmor %vm725_vm6, %vm726_vm7 }
 0x122   :  { %460 = vperm.xlu1 %1572, %v1953_v57   ;;  %v364_v4 = vpop.permute.xlu2 %363  ;;  %v808_v44 = vsel %vm805_vm13, %v807_v24, %v803_v7  ;;  %v2105_v41 = vpop.eup %1609  ;;  %v736_v11 = vmul.f32 %v2099_v37, %v2072_v47  ;;  %v584_v7 = vmul.f32 1.442695, %v542_v43  ;;  %vm741_vm10 = vweird.f32 %v2099_v37 }
 0x123   :  { %v514_v36 = vadd.f32 %v364_v4, %v1956_v59  ;;  %1200 = vperm.xlu0 %1575, %v808_v44   ;;  %v1612_v27 = vpop.eup %1611  ;;  %v691_v60 = vmul.f32 %v2105_v41, %v2077_v45  ;;  %v717_v44 = vor.u32 1.1754944e-38, %v716_v48  ;;  %vm696_vm8 = vweird.f32 %v2105_v41  ;;  %vm2198_vm13 = vmor %vm740_vm12, %vm741_vm10 }
 0x124   :  { %v352_v39 = vpop.permute.xlu1 %351  ;;  %v2134_v58 = vadd.f32 1.0, %v1612_v27  ;;  %v737_v54 = vsub.f32 1.0, %v736_v11  ;;  %v2163_v27 = vor.u32 1.1754944e-38, %v701_v34  ;;  %vm2214_vm15 = vmor %vm695_vm5, %vm696_vm8 }
 0x125   :  { %v546_v53 = vsub.f32 0.0, %v514_v36  ;;  %v512_v62 = vadd.f32 %v352_v39, %v1961_v61  ;;  %v2123_v61 = vpop.eup %1613  ;;  %v692_v33 = vsub.f32 1.0, %v691_v60  ;;  %v722_v36 = vsub.f32 1.0, %v721_v56 }
 0x126   :  { %v1616_v0 = vpop.eup %1615  ;;  %v781_v29 = vmul.f32 %v2123_v61, %v2081_v50  ;;  %v731_v39 = vand.u32 2147483648, %v2069_v38  ;;  %v718_v42 = vsel %vm715_vm4, %v717_v44, %v713_v32  ;;  %v738_v31 = vmul.f32 %v2099_v37, %v737_v54 }
 0x127   :  { %v592_v46 = vmul.f32 1.442695, %v546_v53  ;;  %v544_v20 = vsub.f32 0.0, %v512_v62  ;;  %v2150_v4 = vadd.f32 1.0, %v1616_v0  ;;  %v699_v62 = vand.u32 2147483647, %v2077_v45 }
 0x128   :  { %454 = vperm.xlu2 %1571, %v1953_v57   ;;  %v782_v40 = vsub.f32 1.0, %v781_v29  ;;  %v693_v3 = vmul.f32 %v2105_v41, %v692_v33  ;;  %v723_v2 = vmul.f32 %v2092_v25, %v722_v36  ;;  %v2168_v5 = vor.u32 1.1754944e-38, %v731_v39 }
 0x129   :  { %1617 = vpow2.f32 %v592_v46  ;;  %v588_v24 = vmul.f32 1.442695, %v544_v20  ;;  %v739_v56 = vadd.f32 %v2099_v37, %v738_v31  ;;  %vm2183_vm11 = vcmp.eq.f32.partialorder %v699_v62, 8.507059e+37 }
 0x12a   :  { %1619 = vpow2.f32 %v590_v49  ;;  %1574 = vset.pattern.permute.xlu1 %v1731_v22  ;;  %v724_v32 = vadd.f32 %v2092_v25, %v723_v2  ;;  %vm786_vm14 = vweird.f32 %v2123_v61  ;;  %v789_v31 = vand.u32 2147483647, %v2081_v50 }
 0x12b   :  { %1621 = vpow2.f32 %v588_v24  ;;  %1173 = vperm.xlu1 %1574, %v673_v28   ;;  %v746_v24 = vand.u32 2147483648, %v2072_v47  ;;  %v694_v28 = vadd.f32 %v2105_v41, %v693_v3  ;;  %v743_v36 = vsel %vm2198_vm13, %v2099_v37, %v739_v56  ;;  %vm2237_vm2 = vmor %vm785_vm9, %vm786_vm14 }
 0x12c   :  { %1623 = vrcp.f32 %v2134_v58  ;;  %vm790_vm3 = vcmp.eq.f32.partialorder %v789_v31, 8.507059e+37  ;;  %vm730_vm4 = vcmp.eq.f32.partialorder %v729_v52, 8.507059e+37  ;;  %vm770_vm6 = vweird.f32 %v2150_v4 }
 0x12d   :  { %1625 = vpow2.f32 %v584_v7  ;;  %v744_v7 = vand.u32 2147483647, %v2072_v47  ;;  %v774_v52 = vand.u32 2147483647, %v2150_v4 }
 0x12e   :  { %1627 = vrcp.f32 %v2150_v4 }
 0x12f   :  { %v1618_v53 = vpop.eup %1617  ;;  %1629 = vpow2.f32 %v600_v35  ;;  %vm745_vm1 = vcmp.eq.f32.partialorder %v744_v7, 8.507059e+37  ;;  %vm2293_vm12 = vcmp.eq.f32.partialorder %v774_v52, 8.507059e+37 }
 0x130   :  { %v1620_v59 = vpop.eup %1619  ;;  %1573 = vset.pattern.permute.xlu2 %v1989_v8  ;;  %v2170_v43 = vadd.f32 1.0, %v1618_v53  ;;  %v783_v8 = vmul.f32 %v2123_v61, %v782_v40  ;;  %v747_v40 = vor.u32 1.1754944e-38, %v746_v24  ;;  %v698_v53 = vsel %vm2214_vm15, %v2105_v41, %v694_v28 }
 0x131   :  { %v1622_v49 = vpop.eup %1621  ;;  %v2178_v48 = vadd.f32 1.0, %v1620_v59  ;;  %v728_v41 = vsel %vm2229_vm0, %v2092_v25, %v724_v32  ;;  %v703_v25 = vsel %vm2183_vm11, %v2163_v27, %v698_v53  ;;  %vm830_vm11 = vweird.f32 %v2134_v58 }
 0x132   :  { %v2172_v46 = vadd.f32 1.0, %v1622_v49  ;;  %v377_v20 = vpop.permute.xlu2 %376  ;;  %v2176_v11 = vpop.eup %1623  ;;  %v784_v33 = vadd.f32 %v2123_v61, %v783_v8  ;;  %v748_v49 = vsel %vm745_vm1, %v747_v40, %v743_v36  ;;  %v792_v8 = vor.u32 1.1754944e-38, %v791_v51 }
 0x133   :  { %v516_v60 = vadd.f32 %v377_v20, %v2001_v12  ;;  %1182 = vperm.xlu1 %1574, %v718_v42   ;;  %v1626_v29 = vpop.eup %1625  ;;  %v733_v28 = vsel %vm730_vm4, %v2168_v5, %v728_v41  ;;  %v776_v5 = vand.u32 2147483648, %v2150_v4  ;;  %vm831_vm9 = vweird.f32 %v2176_v11 }
 0x134   :  { %1631 = vrcp.f32 %v2172_v46  ;;  %v370_v23 = vpop.permute.xlu1 %369  ;;  %v2195_v54 = vpop.eup %1627  ;;  %v2218_v42 = vadd.f32 1.0, %v1626_v29  ;;  %v788_v2 = vsel %vm2237_vm2, %v2123_v61, %v784_v33  ;;  %v851_v7 = vand.u32 2147483648, %v2172_v46  ;;  %vm2301_vm13 = vmor %vm830_vm11, %vm831_vm9 }
 0x135   :  { %v515_v12 = vadd.f32 %v370_v23, %v1968_v63  ;;  %1633 = vrcp.f32 %v2170_v43  ;;  %v826_v63 = vmul.f32 %v2176_v11, %v2134_v58  ;;  %v1630_v34 = vpop.eup %1629  ;;  %v548_v47 = vsub.f32 0.0, %v516_v60  ;;  %v419_v29 = vpop.permute.xlu0 %418 }
 0x136   :  { %1635 = vrcp.f32 %v2178_v48  ;;  %v766_v62 = vmul.f32 %v2195_v54, %v2150_v4  ;;  %v2246_v3 = vadd.f32 1.0, %v1630_v34  ;;  %v793_v23 = vsel %vm790_vm3, %v792_v8, %v788_v2 }
 0x137   :  { %v547_v35 = vsub.f32 0.0, %v515_v12  ;;  %v827_v50 = vsub.f32 1.0, %v826_v63  ;;  %v596_v20 = vmul.f32 1.442695, %v548_v47  ;;  %v849_v12 = vand.u32 2147483647, %v2172_v46 }
 0x138   :  { %466 = vperm.xlu2 %1573, %v1953_v57   ;;  %v767_v51 = vsub.f32 1.0, %v766_v62  ;;  %v523_v33 = vadd.f32 %v419_v29, %v1994_v10  ;;  %vm845_vm7 = vweird.f32 %v2172_v46  ;;  %v852_v36 = vor.u32 1.1754944e-38, %v851_v7 }
 0x139   :  { %v594_v37 = vmul.f32 1.442695, %v547_v35  ;;  %v828_v27 = vmul.f32 %v2176_v11, %v827_v50  ;;  %vm850_vm10 = vcmp.eq.f32.partialorder %v849_v12, 8.507059e+37  ;;  %vm771_vm14 = vweird.f32 %v2195_v54 }
 0x13a   :  { %v1632_v59 = vpop.eup %1631  ;;  %v768_v34 = vmul.f32 %v2195_v54, %v767_v51  ;;  %v555_v2 = vsub.f32 0.0, %v523_v33  ;;  %v777_v51 = vor.u32 1.1754944e-38, %v776_v5  ;;  %vm2317_vm0 = vmor %vm770_vm6, %vm771_vm14  ;;  %vm815_vm2 = vweird.f32 %v2218_v42 }
 0x13b   :  { %1637 = vpow2.f32 %v594_v37  ;;  %1188 = vperm.xlu1 %1574, %v748_v49   ;;  %v841_v60 = vmul.f32 %v1632_v59, %v2172_v46  ;;  %v2252_v56 = vpop.eup %1633  ;;  %vm846_vm5 = vweird.f32 %v1632_v59  ;;  %v829_v39 = vadd.f32 %v2176_v11, %v828_v27 }
 0x13c   :  { %1639 = vrcp.f32 %v2218_v42  ;;  %v2260_v61 = vpop.eup %1635  ;;  %v871_v38 = vmul.f32 %v2252_v56, %v2170_v43  ;;  %vm847_vm8 = vmor %vm845_vm7, %vm846_vm5  ;;  %v836_v37 = vand.u32 2147483648, %v2134_v58  ;;  %vm876_vm1 = vweird.f32 %v2252_v56 }
 0x13d   :  { %v842_v24 = vsub.f32 1.0, %v841_v60  ;;  %1641 = vrcp.f32 %v2246_v3  ;;  %v856_v32 = vmul.f32 %v2260_v61, %v2178_v48  ;;  %v833_v60 = vsel %vm2301_vm13, %v2176_v11, %v829_v39 }
 0x13e   :  { %1643 = vpow2.f32 %v596_v20  ;;  %v872_v46 = vsub.f32 1.0, %v871_v38  ;;  %v769_v20 = vadd.f32 %v2195_v54, %v768_v34  ;;  %vm875_vm3 = vweird.f32 %v2170_v43 }
 0x13f   :  { %v843_v0 = vmul.f32 %v1632_v59, %v842_v24  ;;  %v837_v24 = vor.u32 1.1754944e-38, %v836_v37  ;;  %vm2336_vm4 = vmor %vm875_vm3, %vm876_vm1  ;;  %v819_v39 = vand.u32 2147483647, %v2218_v42  ;;  %vm861_vm5 = vweird.f32 %v2260_v61 }
 0x140   :  { %1576 = vset.pattern.permute.xlu2 %v1731_v22  ;;  %v773_v52 = vsel %vm2317_vm0, %v2195_v54, %v769_v20  ;;  %v879_v54 = vand.u32 2147483647, %v2170_v43  ;;  %v821_v50 = vand.u32 2147483648, %v2218_v42  ;;  %vm935_vm14 = vweird.f32 %v2246_v3 }
 0x141   :  { %v1638_v44 = vpop.eup %1637  ;;  %1179 = vperm.xlu2 %1576, %v703_v25   ;;  %v844_v63 = vadd.f32 %v1632_v59, %v843_v0  ;;  %v873_v25 = vmul.f32 %v2252_v56, %v872_v46  ;;  %v610_v0 = vmul.f32 1.442695, %v555_v2  ;;  %v778_v34 = vsel %vm2293_vm12, %v777_v51, %v773_v52 }
 0x142   :  { %v2278_v47 = vpop.eup %1639  ;;  %v2280_v22 = vadd.f32 1.0, %v1638_v44  ;;  %v395_v35 = vpop.permute.xlu2 %394  ;;  %vm860_vm1 = vweird.f32 %v2178_v48  ;;  %v866_v52 = vand.u32 2147483648, %v2178_v48 }
 0x143   :  { %v519_v10 = vadd.f32 %v395_v35, %v2010_v15  ;;  %1197 = vperm.xlu1 %1574, %v793_v23   ;;  %v848_v40 = vsel %vm847_vm8, %v1632_v59, %v844_v63  ;;  %v2286_v53 = vpop.eup %1641  ;;  %v834_v15 = vand.u32 2147483647, %v2134_v58  ;;  %v811_v49 = vmul.f32 %v2278_v47, %v2218_v42 }
 0x144   :  { %1645 = vrcp.f32 %v2280_v22  ;;  %v383_v31 = vpop.permute.xlu1 %382  ;;  %v853_v45 = vsel %vm850_vm10, %v852_v36, %v848_v40  ;;  %v1644_v57 = vpop.eup %1643  ;;  %v931_v29 = vmul.f32 %v2286_v53, %v2246_v3  ;;  %v896_v36 = vand.u32 2147483648, %v2280_v22 }
 0x145   :  { %v551_v41 = vsub.f32 0.0, %v519_v10  ;;  %v517_v62 = vadd.f32 %v383_v31, %v1970_v1  ;;  %1209 = vperm.xlu0 %1575, %v853_v45   ;;  %v857_v1 = vsub.f32 1.0, %v856_v32  ;;  %v2311_v23 = vadd.f32 1.0, %v1644_v57 }
 0x146   :  { %vm835_vm15 = vcmp.eq.f32.partialorder %v834_v15, 8.507059e+37  ;;  %v812_v11 = vsub.f32 1.0, %v811_v49  ;;  %v881_v32 = vand.u32 2147483648, %v2170_v43  ;;  %v932_v44 = vsub.f32 1.0, %v931_v29 }
 0x147   :  { %v602_v58 = vmul.f32 1.442695, %v551_v41  ;;  %v549_v8 = vsub.f32 0.0, %v517_v62  ;;  %v838_v38 = vsel %vm835_vm15, %v837_v24, %v833_v60  ;;  %v858_v5 = vmul.f32 %v2260_v61, %v857_v1 }
 0x148   :  { %v813_v63 = vmul.f32 %v2278_v47, %v812_v11  ;;  %v894_v46 = vand.u32 2147483647, %v2280_v22  ;;  %v882_v45 = vor.u32 1.1754944e-38, %v881_v32  ;;  %vm816_vm7 = vweird.f32 %v2278_v47 }
 0x149   :  { %1647 = vpow2.f32 %v602_v58  ;;  %v598_v12 = vmul.f32 1.442695, %v549_v8  ;;  %1185 = vperm.xlu2 %1576, %v733_v28   ;;  %v874_v28 = vadd.f32 %v2252_v56, %v873_v25  ;;  %v933_v37 = vmul.f32 %v2286_v53, %v932_v44  ;;  %vm2366_vm12 = vmor %vm815_vm2, %vm816_vm7 }
 0x14a   :  { %v1646_v27 = vpop.eup %1645  ;;  %vm880_vm8 = vcmp.eq.f32.partialorder %v879_v54, 8.507059e+37  ;;  %vm890_vm9 = vweird.f32 %v2280_v22  ;;  %v814_v62 = vadd.f32 %v2278_v47, %v813_v63  ;;  %v897_v2 = vor.u32 1.1754944e-38, %v896_v36  ;;  %vm2398_vm2 = vmor %vm860_vm1, %vm861_vm5 }
 0x14b   :  { %1649 = vpow2.f32 %v598_v12  ;;  %1206 = vperm.xlu1 %1574, %v838_v38   ;;  %v886_v4 = vmul.f32 %v1646_v27, %v2280_v22  ;;  %v878_v43 = vsel %vm2336_vm4, %v2252_v56, %v874_v28  ;;  %vm891_vm6 = vweird.f32 %v1646_v27 }
 0x14c   :  { %1651 = vrcp.f32 %v2311_v23  ;;  %v883_v49 = vsel %vm880_vm8, %v882_v45, %v878_v43  ;;  %vm892_vm10 = vmor %vm890_vm9, %vm891_vm6  ;;  %vm895_vm11 = vcmp.eq.f32.partialorder %v894_v46, 8.507059e+37  ;;  %v934_v25 = vadd.f32 %v2286_v53, %v933_v37 }
 0x14d   :  { %v887_v33 = vsub.f32 1.0, %v886_v4  ;;  %1653 = vpow2.f32 %v610_v0  ;;  %vm936_vm13 = vweird.f32 %v2286_v53  ;;  %v818_v51 = vsel %vm2366_vm12, %v2278_v47, %v814_v62 }
 0x14e   :  { %v822_v42 = vor.u32 1.1754944e-38, %v821_v50  ;;  %v941_v12 = vand.u32 2147483648, %v2246_v3  ;;  %v859_v7 = vadd.f32 %v2260_v61, %v858_v5  ;;  %vm820_vm15 = vcmp.eq.f32.partialorder %v819_v39, 8.507059e+37  ;;  %vm2384_vm0 = vmor %vm935_vm14, %vm936_vm13  ;;  %v449_v5 = vpop.permute.xlu0 %448 }
 0x14f   :  { %v1648_v10 = vpop.eup %1647  ;;  %v888_v40 = vmul.f32 %v1646_v27, %v887_v33  ;;  %v864_v38 = vand.u32 2147483647, %v2178_v48  ;;  %v867_v36 = vor.u32 1.1754944e-38, %v866_v52  ;;  %vm905_vm6 = vweird.f32 %v2311_v23 }
 0x150   :  { %v2347_v31 = vadd.f32 1.0, %v1648_v10  ;;  %v823_v0 = vsel %vm820_vm15, %v822_v42, %v818_v51  ;;  %v942_v33 = vor.u32 1.1754944e-38, %v941_v12  ;;  %v863_v48 = vsel %vm2398_vm2, %v2260_v61, %v859_v7 }
 0x151   :  { %v1650_v57 = vpop.eup %1649  ;;  %1194 = vperm.xlu2 %1576, %v778_v34   ;;  %v889_v41 = vadd.f32 %v1646_v27, %v888_v40  ;;  %vm865_vm4 = vcmp.eq.f32.partialorder %v864_v38, 8.507059e+37 }
 0x152   :  { %v2353_v56 = vpop.eup %1651  ;;  %v2355_v15 = vadd.f32 1.0, %v1650_v57  ;;  %v407_v59 = vpop.permute.xlu2 %406  ;;  %1655 = vrcp.f32 %v2347_v31  ;;  %v868_v40 = vsel %vm865_vm4, %v867_v36, %v863_v48  ;;  %vm950_vm14 = vweird.f32 %v2347_v31 }
 0x153   :  { %v521_v20 = vadd.f32 %v407_v59, %v1991_v9  ;;  %1215 = vperm.xlu1 %1574, %v883_v49   ;;  %v893_v1 = vsel %vm892_vm10, %v1646_v27, %v889_v41  ;;  %v1654_v22 = vpop.eup %1653  ;;  %v901_v29 = vmul.f32 %v2353_v56, %v2311_v23  ;;  %vm906_vm8 = vweird.f32 %v2353_v56 }
 0x154   :  { %1657 = vrcp.f32 %v2355_v15  ;;  %v401_v58 = vpop.permute.xlu1 %400  ;;  %v898_v8 = vsel %vm895_vm11, %v897_v2, %v893_v1  ;;  %v2405_v63 = vadd.f32 1.0, %v1654_v22  ;;  %v926_v61 = vand.u32 2147483648, %v2355_v15  ;;  %vm907_vm11 = vmor %vm905_vm6, %vm906_vm8 }
 0x155   :  { %v553_v9 = vsub.f32 0.0, %v521_v20  ;;  %v520_v24 = vadd.f32 %v401_v58, %v1982_v6  ;;  %1218 = vperm.xlu0 %1575, %v898_v8   ;;  %v939_v6 = vand.u32 2147483647, %v2246_v3  ;;  %v938_v3 = vsel %vm2384_vm0, %v2286_v53, %v934_v25 }
 0x156   :  { %v902_v44 = vsub.f32 1.0, %v901_v29  ;;  %v528_v53 = vadd.f32 %v449_v5, %v2031_v26  ;;  %v924_v26 = vand.u32 2147483647, %v2355_v15  ;;  %vm920_vm7 = vweird.f32 %v2355_v15 }
 0x157   :  { %v606_v11 = vmul.f32 1.442695, %v553_v9  ;;  %v552_v27 = vsub.f32 0.0, %v520_v24  ;;  %vm940_vm3 = vcmp.eq.f32.partialorder %v939_v6, 8.507059e+37  ;;  %v927_v20 = vor.u32 1.1754944e-38, %v926_v61 }
 0x158   :  { %v2391_v28 = vpop.eup %1655  ;;  %v943_v35 = vsel %vm940_vm3, %v942_v33, %v938_v3  ;;  %v903_v43 = vmul.f32 %v2353_v56, %v902_v44  ;;  %v560_v37 = vsub.f32 0.0, %v528_v53  ;;  %v911_v1 = vand.u32 2147483648, %v2311_v23 }
 0x159   :  { %1659 = vpow2.f32 %v606_v11  ;;  %v604_v4 = vmul.f32 1.442695, %v552_v27  ;;  %1203 = vperm.xlu2 %1576, %v823_v0   ;;  %v946_v39 = vmul.f32 %v2391_v28, %v2347_v31  ;;  %vm925_vm10 = vcmp.eq.f32.partialorder %v924_v26, 8.507059e+37 }
 0x15a   :  { %v1658_v54 = vpop.eup %1657  ;;  %v904_v49 = vadd.f32 %v2353_v56, %v903_v43  ;;  %v912_v29 = vor.u32 1.1754944e-38, %v911_v1  ;;  %v620_v42 = vmul.f32 1.442695, %v560_v37  ;;  %vm951_vm13 = vweird.f32 %v2391_v28 }
 0x15b   :  { %1661 = vpow2.f32 %v604_v4  ;;  %v916_v34 = vmul.f32 %v1658_v54, %v2355_v15  ;;  %vm921_vm5 = vweird.f32 %v1658_v54  ;;  %v947_v41 = vsub.f32 1.0, %v946_v39  ;;  %vm2444_vm15 = vmor %vm950_vm14, %vm951_vm13 }
 0x15c   :  { %1663 = vrcp.f32 %v2405_v63  ;;  %vm922_vm9 = vmor %vm920_vm7, %vm921_vm5  ;;  %v909_v15 = vand.u32 2147483647, %v2311_v23  ;;  %v954_v47 = vand.u32 2147483647, %v2347_v31  ;;  %v956_v38 = vand.u32 2147483648, %v2347_v31 }
 0x15d   :  { %1227 = vperm.xlu0 %1575, %v943_v35   ;;  %v917_v10 = vsub.f32 1.0, %v916_v34  ;;  %v948_v25 = vmul.f32 %v2391_v28, %v947_v41 }
 0x15e   :  { %vm910_vm12 = vcmp.eq.f32.partialorder %v909_v15, 8.507059e+37  ;;  %vm955_vm1 = vcmp.eq.f32.partialorder %v954_v47, 8.507059e+37  ;;  %v957_v48 = vor.u32 1.1754944e-38, %v956_v38 }
 0x15f   :  { %v1660_v46 = vpop.eup %1659  ;;  %v918_v45 = vmul.f32 %v1658_v54, %v917_v10  ;;  %v949_v23 = vadd.f32 %v2391_v28, %v948_v25 }
 0x160   :  { %v2415_v57 = vadd.f32 1.0, %v1660_v46 }
 0x161   :  { %v1662_v62 = vpop.eup %1661  ;;  %1212 = vperm.xlu2 %1576, %v868_v40   ;;  %v919_v59 = vadd.f32 %v1658_v54, %v918_v45  ;;  %v953_v3 = vsel %vm2444_vm15, %v2391_v28, %v949_v23 }
 0x162   :  { %1665 = vrcp.f32 %v2415_v57  ;;  %v2422_v2 = vadd.f32 1.0, %v1662_v62  ;;  %v425_v50 = vpop.permute.xlu2 %424  ;;  %v2432_v9 = vpop.eup %1663  ;;  %v986_v32 = vand.u32 2147483648, %v2415_v57  ;;  %v984_v31 = vand.u32 2147483647, %v2415_v57 }
 0x163   :  { %v524_v22 = vadd.f32 %v425_v50, %v2004_v13  ;;  %v923_v58 = vsel %vm922_vm9, %v1658_v54, %v919_v59  ;;  %v908_v13 = vsel %vm907_vm11, %v2353_v56, %v904_v49  ;;  %v1006_v6 = vmul.f32 %v2432_v9, %v2405_v63 }
 0x164   :  { %1667 = vrcp.f32 %v2422_v2  ;;  %v413_v8 = vpop.permute.xlu1 %412  ;;  %v928_v60 = vsel %vm925_vm10, %v927_v20, %v923_v58  ;;  %v913_v27 = vsel %vm910_vm12, %v912_v29, %v908_v13  ;;  %vm980_vm2 = vweird.f32 %v2415_v57 }
 0x165   :  { %v556_v24 = vsub.f32 0.0, %v524_v22  ;;  %v522_v51 = vadd.f32 %v413_v8, %v2019_v18  ;;  %1224 = vperm.xlu1 %1574, %v928_v60   ;;  %v1007_v44 = vsub.f32 1.0, %v1006_v6  ;;  %v971_v34 = vand.u32 2147483648, %v2422_v2 }
 0x166   :  { %v969_v28 = vand.u32 2147483647, %v2422_v2  ;;  %v958_v10 = vsel %vm955_vm1, %v957_v48, %v953_v3  ;;  %v987_v43 = vor.u32 1.1754944e-38, %v986_v32  ;;  %vm985_vm5 = vcmp.eq.f32.partialorder %v984_v31, 8.507059e+37 }
 0x167   :  { %v612_v12 = vmul.f32 1.442695, %v556_v24  ;;  %v554_v7 = vsub.f32 0.0, %v522_v51  ;;  %v1008_v40 = vmul.f32 %v2432_v9, %v1007_v44  ;;  %vm965_vm6 = vweird.f32 %v2422_v2 }
 0x168   :  { %v1666_v11 = vpop.eup %1665  ;;  %v972_v62 = vor.u32 1.1754944e-38, %v971_v34  ;;  %vm970_vm8 = vcmp.eq.f32.partialorder %v969_v28, 8.507059e+37  ;;  %vm1011_vm9 = vweird.f32 %v2432_v9  ;;  %v1016_v58 = vand.u32 2147483648, %v2405_v63 }
 0x169   :  { %1669 = vpow2.f32 %v612_v12  ;;  %v608_v0 = vmul.f32 1.442695, %v554_v7  ;;  %1221 = vperm.xlu2 %1576, %v913_v27   ;;  %v976_v18 = vmul.f32 %v1666_v11, %v2415_v57  ;;  %vm981_vm0 = vweird.f32 %v1666_v11 }
 0x16a   :  { %v1668_v56 = vpop.eup %1667  ;;  %vm982_vm4 = vmor %vm980_vm2, %vm981_vm0  ;;  %v1009_v22 = vadd.f32 %v2432_v9, %v1008_v40  ;;  %vm1010_vm10 = vweird.f32 %v2405_v63  ;;  %v1017_v29 = vor.u32 1.1754944e-38, %v1016_v58 }
 0x16b   :  { %1671 = vpow2.f32 %v608_v0  ;;  %v977_v5 = vsub.f32 1.0, %v976_v18  ;;  %v961_v4 = vmul.f32 %v1668_v56, %v2422_v2  ;;  %vm966_vm3 = vweird.f32 %v1668_v56  ;;  %vm1012_vm11 = vmor %vm1010_vm10, %vm1011_vm9 }
 0x16c   :  { %1673 = vpow2.f32 %v620_v42  ;;  %vm967_vm7 = vmor %vm965_vm6, %vm966_vm3 }
 0x16d   :  { %v978_v54 = vmul.f32 %v1666_v11, %v977_v5  ;;  %v962_v33 = vsub.f32 1.0, %v961_v4 }
 0x16f   :  { %v1670_v53 = vpop.eup %1669  ;;  %v979_v35 = vadd.f32 %v1666_v11, %v978_v54  ;;  %v963_v36 = vmul.f32 %v1668_v56, %v962_v33 }
 0x170   :  { %v2457_v39 = vadd.f32 1.0, %v1670_v53 }
 0x171   :  { %v1672_v61 = vpop.eup %1671  ;;  %1230 = vperm.xlu2 %1576, %v958_v10   ;;  %v983_v46 = vsel %vm982_vm4, %v1666_v11, %v979_v35  ;;  %v964_v45 = vadd.f32 %v1668_v56, %v963_v36 }
 0x172   :  { %v1674_v26 = vpop.eup %1673  ;;  %1675 = vrcp.f32 %v2457_v39  ;;  %v2462_v37 = vadd.f32 1.0, %v1672_v61  ;;  %v437_v57 = vpop.permute.xlu2 %436  ;;  %v988_v41 = vsel %vm985_vm5, %v987_v43, %v983_v46  ;;  %v1031_v7 = vand.u32 2147483648, %v2457_v39 }
 0x173   :  { %v526_v59 = vadd.f32 %v437_v57, %v2007_v14  ;;  %1236 = vperm.xlu0 %1575, %v988_v41   ;;  %v968_v49 = vsel %vm967_vm7, %v1668_v56, %v964_v45  ;;  %v1014_v14 = vand.u32 2147483647, %v2405_v63  ;;  %v2473_v25 = vadd.f32 1.0, %v1674_v26 }
 0x174   :  { %1677 = vrcp.f32 %v2462_v37  ;;  %v431_v50 = vpop.permute.xlu1 %430  ;;  %v973_v20 = vsel %vm970_vm8, %v972_v62, %v968_v49  ;;  %v1029_v27 = vand.u32 2147483647, %v2457_v39  ;;  %vm1025_vm14 = vweird.f32 %v2457_v39 }
 0x175   :  { %v558_v2 = vsub.f32 0.0, %v526_v59  ;;  %v525_v1 = vadd.f32 %v431_v50, %v2025_v21  ;;  %1233 = vperm.xlu1 %1574, %v973_v20   ;;  %v1013_v21 = vsel %vm1012_vm11, %v2432_v9, %v1009_v22  ;;  %vm1015_vm12 = vcmp.eq.f32.partialorder %v1014_v14, 8.507059e+37 }
 0x176   :  { %v1018_v63 = vsel %vm1015_vm12, %v1017_v29, %v1013_v21  ;;  %v1001_v23 = vand.u32 2147483648, %v2462_v37  ;;  %v999_v56 = vand.u32 2147483647, %v2462_v37  ;;  %v1032_v38 = vor.u32 1.1754944e-38, %v1031_v7 }
 0x177   :  { %v616_v15 = vmul.f32 1.442695, %v558_v2  ;;  %v557_v8 = vsub.f32 0.0, %v525_v1  ;;  %vm1030_vm1 = vcmp.eq.f32.partialorder %v1029_v27, 8.507059e+37  ;;  %vm995_vm2 = vweird.f32 %v2462_v37 }
 0x178   :  { %v1676_v60 = vpop.eup %1675  ;;  %v1002_v31 = vor.u32 1.1754944e-38, %v1001_v23  ;;  %vm1000_vm4 = vcmp.eq.f32.partialorder %v999_v56, 8.507059e+37  ;;  %v1091_v7 = vand.u32 2147483648, %v2473_v25  ;;  %v1177_v56 = vpop.permute.xlu0 %1176 }
 0x179   :  { %1679 = vpow2.f32 %v616_v15  ;;  %v614_v24 = vmul.f32 1.442695, %v557_v8  ;;  %v1021_v51 = vmul.f32 %v1676_v60, %v2457_v39  ;;  %vm1026_vm13 = vweird.f32 %v1676_v60 }
 0x17a   :  { %v1678_v13 = vpop.eup %1677  ;;  %vm1027_vm0 = vmor %vm1025_vm14, %vm1026_vm13  ;;  %vm1085_vm14 = vweird.f32 %v2473_v25 }
 0x17b   :  { %1681 = vpow2.f32 %v614_v24  ;;  %v1022_v42 = vsub.f32 1.0, %v1021_v51  ;;  %v991_v12 = vmul.f32 %v1678_v13, %v2462_v37  ;;  %vm996_vm15 = vweird.f32 %v1678_v13 }
 0x17c   :  { %1683 = vrcp.f32 %v2473_v25  ;;  %vm997_vm3 = vmor %vm995_vm2, %vm996_vm15  ;;  %vm1277_vm2 = vcmask 195712  }
 0x17d   :  { %1242 = vperm.xlu1 %1574, %v1018_v63   ;;  %v1023_v11 = vmul.f32 %v1676_v60, %v1022_v42  ;;  %v992_v9 = vsub.f32 1.0, %v991_v12  ;;  %v2503_v42 = vand.u32 127, %v275_v55 }
 0x17f   :  { %v1680_v6 = vpop.eup %1679  ;;  %v1024_v0 = vadd.f32 %v1676_v60, %v1023_v11  ;;  %v993_v18 = vmul.f32 %v1678_v13, %v992_v9 }
 0x180   :  { %v654_v47 = vadd.f32 1.0, %v1680_v6 }
 0x181   :  { %v1682_v52 = vpop.eup %1681  ;;  %v1028_v5 = vsel %vm1027_vm0, %v1676_v60, %v1024_v0  ;;  %v994_v4 = vadd.f32 %v1678_v13, %v993_v18  ;;  %v2514_v0 = vadd.s32 4294967288, %v2503_v42  ;;  %v1092_v18 = vor.u32 1.1754944e-38, %v1091_v7 }
 0x182   :  { %v2485_v3 = vpop.eup %1683  ;;  %1685 = vrcp.f32 %v654_v47  ;;  %v653_v32 = vadd.f32 1.0, %v1682_v52  ;;  %v455_v44 = vpop.permute.xlu2 %454  ;;  %v1033_v54 = vsel %vm1030_vm1, %v1032_v38, %v1028_v5  ;;  %v1061_v37 = vand.u32 2147483648, %v654_v47 }
 0x183   :  { %v529_v33 = vadd.f32 %v455_v44, %v2015_v17  ;;  %1245 = vperm.xlu0 %1575, %v1033_v54   ;;  %v998_v48 = vsel %vm997_vm3, %v1678_v13, %v994_v4  ;;  %v1081_v28 = vmul.f32 %v2485_v3, %v2473_v25  ;;  %v1059_v41 = vand.u32 2147483647, %v654_v47 }
 0x184   :  { %1687 = vrcp.f32 %v653_v32  ;;  %v443_v34 = vpop.permute.xlu1 %442  ;;  %v1003_v53 = vsel %vm1000_vm4, %v1002_v31, %v998_v48  ;;  %vm1055_vm6 = vweird.f32 %v654_v47  ;;  %v1046_v62 = vand.u32 2147483648, %v653_v32 }
 0x185   :  { %v561_v35 = vsub.f32 0.0, %v529_v33  ;;  %v527_v36 = vadd.f32 %v443_v34, %v2013_v16  ;;  %1239 = vperm.xlu2 %1576, %v1003_v53   ;;  %v1082_v46 = vsub.f32 1.0, %v1081_v28  ;;  %v1044_v2 = vand.u32 2147483647, %v653_v32 }
 0x186   :  { %v1062_v22 = vor.u32 1.1754944e-38, %v1061_v37  ;;  %vm1086_vm9 = vweird.f32 %v2485_v3  ;;  %vm1060_vm10 = vcmp.eq.f32.partialorder %v1059_v41, 8.507059e+37  ;;  %vm1040_vm11 = vweird.f32 %v653_v32 }
 0x187   :  { %v622_v39 = vmul.f32 1.442695, %v561_v35  ;;  %v559_v10 = vsub.f32 0.0, %v527_v36  ;;  %v1083_v59 = vmul.f32 %v2485_v3, %v1082_v46  ;;  %v1047_v21 = vor.u32 1.1754944e-38, %v1046_v62  ;;  %vm1087_vm15 = vmor %vm1085_vm14, %vm1086_vm9 }
 0x188   :  { %v1686_v43 = vpop.eup %1685  ;;  %vm1045_vm13 = vcmp.eq.f32.partialorder %v1044_v2, 8.507059e+37  ;;  %v2518_v52 = vadd.s32 4294967280, %v2503_v42  ;;  %vm1273_vm1 = vcmask 130112  }
 0x189   :  { %1689 = vpow2.f32 %v622_v39  ;;  %v618_v40 = vmul.f32 1.442695, %v559_v10  ;;  %v1051_v61 = vmul.f32 %v1686_v43, %v654_v47  ;;  %vm1056_vm5 = vweird.f32 %v1686_v43 }
 0x18a   :  { %v1688_v17 = vpop.eup %1687  ;;  %vm1057_vm8 = vmor %vm1055_vm6, %vm1056_vm5  ;;  %v1084_v29 = vadd.f32 %v2485_v3, %v1083_v59 }
 0x18b   :  { %1691 = vpow2.f32 %v618_v40  ;;  %v1052_v45 = vsub.f32 1.0, %v1051_v61  ;;  %v1036_v26 = vmul.f32 %v1688_v17, %v653_v32  ;;  %vm1041_vm7 = vweird.f32 %v1688_v17 }
 0x18c   :  { %vm1042_vm12 = vmor %vm1040_vm11, %vm1041_vm7  ;;  %v1088_v23 = vsel %vm1087_vm15, %v2485_v3, %v1084_v29  ;;  %v1272_v3 = vperm.slane %v1177_v56, %v2514_v0 }
 0x18d   :  { %v1053_v57 = vmul.f32 %v1686_v43, %v1052_v45  ;;  %v1037_v16 = vsub.f32 1.0, %v1036_v26 }
 0x18f   :  { %v1690_v49 = vpop.eup %1689  ;;  %v1054_v50 = vadd.f32 %v1686_v43, %v1053_v57  ;;  %v1038_v20 = vmul.f32 %v1688_v17, %v1037_v16 }
 0x190   :  { %v2493_v1 = vadd.f32 1.0, %v1690_v49 }
 0x191   :  { %v1692_v58 = vpop.eup %1691  ;;  %v1058_v15 = vsel %vm1057_vm8, %v1686_v43, %v1054_v50  ;;  %v1039_v8 = vadd.f32 %v1688_v17, %v1038_v20 }
 0x192   :  { %1693 = vrcp.f32 %v2493_v1  ;;  %v2497_v14 = vadd.f32 1.0, %v1692_v58  ;;  %v467_v60 = vpop.permute.xlu2 %466  ;;  %v1063_v24 = vsel %vm1060_vm10, %v1062_v22, %v1058_v15  ;;  %v1106_v44 = vand.u32 2147483648, %v2493_v1 }
 0x193   :  { %v531_v51 = vadd.f32 %v467_v60, %v2036_v30  ;;  %1251 = vperm.xlu1 %1574, %v1063_v24   ;;  %v1043_v13 = vsel %vm1042_vm12, %v1688_v17, %v1039_v8  ;;  %v1089_v30 = vand.u32 2147483647, %v2473_v25  ;;  %v1104_v33 = vand.u32 2147483647, %v2493_v1 }
 0x194   :  { %1695 = vrcp.f32 %v2497_v14  ;;  %v461_v12 = vpop.permute.xlu1 %460  ;;  %v1048_v63 = vsel %vm1045_vm13, %v1047_v21, %v1043_v13  ;;  %vm1100_vm4 = vweird.f32 %v2493_v1  ;;  %v1074_v53 = vand.u32 2147483647, %v2497_v14 }
 0x195   :  { %v563_v11 = vsub.f32 0.0, %v531_v51  ;;  %v530_v27 = vadd.f32 %v461_v12, %v2021_v19  ;;  %1248 = vperm.xlu2 %1576, %v1048_v63   ;;  %vm1090_vm0 = vcmp.eq.f32.partialorder %v1089_v30, 8.507059e+37  ;;  %v1076_v35 = vand.u32 2147483648, %v2497_v14 }
 0x196   :  { %v1093_v25 = vsel %vm1090_vm0, %v1092_v18, %v1088_v23  ;;  %v1107_v61 = vor.u32 1.1754944e-38, %v1106_v44  ;;  %vm1070_vm7 = vweird.f32 %v2497_v14  ;;  %vm1105_vm8 = vcmp.eq.f32.partialorder %v1104_v33, 8.507059e+37 }
 0x197   :  { %v626_v9 = vmul.f32 1.442695, %v563_v11  ;;  %v562_v55 = vsub.f32 0.0, %v530_v27  ;;  %v1077_v41 = vor.u32 1.1754944e-38, %v1076_v35  ;;  %vm1075_vm10 = vcmp.eq.f32.partialorder %v1074_v53, 8.507059e+37 }
 0x198   :  { %v1694_v6 = vpop.eup %1693  ;;  %v1279_v44 = vadd.s32 4294967272, %v2503_v42  ;;  %v1287_v33 = vadd.s32 4294967256, %v2503_v42 }
 0x199   :  { %1697 = vpow2.f32 %v626_v9  ;;  %v624_v19 = vmul.f32 1.442695, %v562_v55  ;;  %v1096_v47 = vmul.f32 %v1694_v6, %v2493_v1  ;;  %vm1101_vm3 = vweird.f32 %v1694_v6  ;;  %v1192_v55 = vpop.permute.xlu0 %1191 }
 0x19a   :  { %v1696_v38 = vpop.eup %1695  ;;  %vm1102_vm6 = vmor %vm1100_vm4, %vm1101_vm3 }
 0x19b   :  { %1699 = vpow2.f32 %v624_v19  ;;  %v1097_v5 = vsub.f32 1.0, %v1096_v47  ;;  %v1066_v4 = vmul.f32 %v1696_v38, %v2497_v14  ;;  %v1180_v32 = vpop.permute.xlu2 %1179  ;;  %vm1071_vm5 = vweird.f32 %v1696_v38 }
 0x19c   :  { %v1276_v28 = vperm.slane %v1180_v32, %v2518_v52  ;;  %vm1072_vm9 = vmor %vm1070_vm7, %vm1071_vm5  ;;  %vm1281_vm5 = vcmask 261312   ;;  %vm1289_vm7 = vcmask 392512  }
 0x19d   :  { %v1174_v54 = vpop.permute.xlu1 %1173  ;;  %1257 = vperm.xlu2 %1576, %v1093_v25   ;;  %v1098_v31 = vmul.f32 %v1694_v6, %v1097_v5  ;;  %v1067_v48 = vsub.f32 1.0, %v1066_v4 }
 0x19e   :  { %v1270_v34 = vperm.slane %v1174_v54, %v2503_v42 }
 0x19f   :  { %v1698_v36 = vpop.eup %1697  ;;  %v1099_v39 = vadd.f32 %v1694_v6, %v1098_v31  ;;  %v1068_v10 = vmul.f32 %v1696_v38, %v1067_v48 }
 0x1a0   :  { %v659_v43 = vadd.f32 1.0, %v1698_v36  ;;  %v1274_v40 = vsel %vm1273_vm1, %v1272_v3, %v1270_v34  ;;  %v1283_v34 = vadd.s32 4294967264, %v2503_v42 }
 0x1a1   :  { %v1700_v17 = vpop.eup %1699  ;;  %v1103_v46 = vsel %vm1102_vm6, %v1694_v6, %v1099_v39  ;;  %v2532_v45 = vsel %vm1277_vm2, %v1276_v28, %v1274_v40  ;;  %v1069_v26 = vadd.f32 %v1696_v38, %v1068_v10  ;;  %v2536_v18 = vpop.permute.xlu0 %1200  ;;  %vm1285_vm6 = vcmask 326912  }
 0x1a2   :  { %1701 = vrcp.f32 %v659_v43  ;;  %v658_v37 = vadd.f32 1.0, %v1700_v17  ;;  %v1108_v57 = vsel %vm1105_vm8, %v1107_v61, %v1103_v46  ;;  %v1136_v1 = vand.u32 2147483648, %v659_v43 }
 0x1a3   :  { %1260 = vperm.xlu1 %1574, %v1108_v57   ;;  %v1073_v16 = vsel %vm1072_vm9, %v1696_v38, %v1069_v26  ;;  %v1134_v58 = vand.u32 2147483647, %v659_v43  ;;  %vm1130_vm12 = vweird.f32 %v659_v43  ;;  %v1186_v27 = vpop.permute.xlu2 %1185  ;;  %v1299_v17 = vadd.s32 4294967232, %v2503_v42 }
 0x1a4   :  { %1703 = vrcp.f32 %v658_v37  ;;  %v1078_v62 = vsel %vm1075_vm10, %v1077_v41, %v1073_v16  ;;  %v1121_v8 = vand.u32 2147483648, %v658_v37  ;;  %v1119_v24 = vand.u32 2147483647, %v658_v37 }
 0x1a5   :  { %1254 = vperm.xlu0 %1575, %v1078_v62   ;;  %v1137_v21 = vor.u32 1.1754944e-38, %v1136_v1  ;;  %vm1135_vm15 = vcmp.eq.f32.partialorder %v1134_v58, 8.507059e+37  ;;  %vm1115_vm0 = vweird.f32 %v658_v37  ;;  %v1183_v11 = vpop.permute.xlu1 %1182  ;;  %v1284_v40 = vperm.slane %v1186_v27, %v1283_v34 }
 0x1a6   :  { %v1122_v12 = vor.u32 1.1754944e-38, %v1121_v8  ;;  %vm1120_vm4 = vcmp.eq.f32.partialorder %v1119_v24, 8.507059e+37  ;;  %v1280_v31 = vperm.slane %v1183_v11, %v1279_v44  ;;  %vm1293_vm8 = vcmask 458112  }
 0x1a7   :  { %v1307_v58 = vadd.s32 4294967216, %v2503_v42  ;;  %v1311_v8 = vadd.s32 4294967208, %v2503_v42  ;;  %vm1305_vm9 = vcmask 654912   ;;  %vm1309_vm10 = vcmask 720512  }
 0x1a8   :  { %v1702_v59 = vpop.eup %1701  ;;  %v1282_v28 = vsel %vm1281_vm5, %v1280_v31, %v2532_v45 }
 0x1a9   :  { %v1126_v49 = vmul.f32 %v1702_v59, %v659_v43  ;;  %vm1131_vm11 = vweird.f32 %v1702_v59  ;;  %v1291_v43 = vadd.s32 4294967248, %v2503_v42  ;;  %v1286_v61 = vsel %vm1285_vm6, %v1284_v40, %v1282_v28 }
 0x1aa   :  { %v1704_v50 = vpop.eup %1703  ;;  %vm1132_vm14 = vmor %vm1130_vm12, %vm1131_vm11  ;;  %vm1313_vm11 = vcmask 786112   ;;  %vm1317_vm12 = vcmask 851712  }
 0x1ab   :  { %v1127_v20 = vsub.f32 1.0, %v1126_v49  ;;  %v1111_v2 = vmul.f32 %v1704_v50, %v658_v37  ;;  %vm1116_vm13 = vweird.f32 %v1704_v50  ;;  %v1195_v9 = vpop.permute.xlu2 %1194  ;;  %v1295_v37 = vadd.s32 4294967240, %v2503_v42 }
 0x1ac   :  { %vm1117_vm3 = vmor %vm1115_vm0, %vm1116_vm13  ;;  %v1292_v16 = vperm.slane %v1192_v55, %v1291_v43  ;;  %vm1321_vm13 = vcmask 917312   ;;  %vm1362_vm0 = vcmask 1041409  }
 0x1ad   :  { %v1128_v22 = vmul.f32 %v1702_v59, %v1127_v20  ;;  %v1112_v15 = vsub.f32 1.0, %v1111_v2  ;;  %v1189_v30 = vpop.permute.xlu1 %1188  ;;  %v1303_v2 = vadd.s32 4294967224, %v2503_v42  ;;  %v1296_v1 = vperm.slane %v1195_v9, %v1295_v37 }
 0x1ae   :  { %v1288_v39 = vperm.slane %v1189_v30, %v1287_v33 }
 0x1af   :  { %v1129_v14 = vadd.f32 %v1702_v59, %v1128_v22  ;;  %v1113_v60 = vmul.f32 %v1704_v50, %v1112_v15 }
 0x1b0   :  { %v1290_v45 = vsel %vm1289_vm7, %v1288_v39, %v1286_v61 }
 0x1b1   :  { %v1133_v51 = vsel %vm1132_vm14, %v1702_v59, %v1129_v14  ;;  %v1114_v13 = vadd.f32 %v1704_v50, %v1113_v60  ;;  %vm1325_vm14 = vcmask 982912  }
 0x1b2   :  { %v1138_v29 = vsel %vm1135_vm15, %v1137_v21, %v1133_v51  ;;  %vm1329_vm15 = vcmask 1048512  }
 0x1b3   :  { %1266 = vperm.xlu2 %1576, %v1138_v29   ;;  %v1118_v63 = vsel %vm1117_vm3, %v1704_v50, %v1114_v13  ;;  %v2534_v6 = vpop.permute.xlu2 %1203  ;;  %v1304_v13 = vperm.slane %v2536_v18, %v1303_v2 }
 0x1b4   :  { %v1123_v7 = vsel %vm1120_vm4, %v1122_v12, %v1118_v63  ;;  %v1315_v12 = vadd.s32 4294967200, %v2503_v42  ;;  %v1308_v9 = vperm.slane %v2534_v6, %v1307_v58 }
 0x1b5   :  { %1263 = vperm.xlu0 %1575, %v1123_v7   ;;  %v1198_v23 = vpop.permute.xlu1 %1197 }
 0x1b6   :  { %v1300_v50 = vperm.slane %v1198_v23, %v1299_v17 }
 0x1b7   :  { %v2542_v47 = vpop.permute.xlu0 %1209 }
 0x1b8   :  { %v1316_v31 = vperm.slane %v2542_v47, %v1315_v12 }
 0x1bb   :  { %v2540_v19 = vpop.permute.xlu2 %1212 }
 0x1bd   :  { %v2538_v56 = vpop.permute.xlu1 %1206 }
 0x1be   :  { %v1312_v27 = vperm.slane %v2538_v56, %v1311_v8 }
 0x1c3   :  { %v1222_v25 = vpop.permute.xlu2 %1221 }
 0x1c4   :  { %v1331_v36 = vperm.slane %v1222_v25, %v2503_v42 }
 0x1c5   :  { %v2544_v38 = vpop.permute.xlu1 %1215 }
 0x1c7   :  { %v2546_v5 = vpop.permute.xlu0 %1218 }
 0x1cb   :  { %v1231_v3 = vpop.permute.xlu2 %1230 }
 0x1cc   :  { %v1336_v57 = vperm.slane %v1231_v3, %v1279_v44  ;;  %v1319_v44 = vadd.s32 4294967192, %v2503_v42 }
 0x1ce   :  { %v1320_v28 = vperm.slane %v2540_v19, %v1319_v44 }
 0x1cf   :  { %v1228_v32 = vpop.permute.xlu0 %1227 }
 0x1d7   :  { %v1225_v4 = vpop.permute.xlu1 %1224 }
 0x1d8   :  { %v1332_v48 = vperm.slane %v1225_v4, %v2514_v0  ;;  %v1334_v0 = vperm.slane %v1228_v32, %v2518_v52  ;;  %v1294_v52 = vsel %vm1293_vm8, %v1292_v16, %v1290_v45  ;;  %v1323_v32 = vadd.s32 4294967184, %v2503_v42 }
 0x1da   :  { %v1333_v10 = vsel %vm1273_vm1, %v1332_v48, %v1331_v36  ;;  %vm1297_vm1 = vcmask 523712  }
 0x1db   :  { %v1335_v46 = vsel %vm1277_vm2, %v1334_v0, %v1333_v10  ;;  %vm1301_vm2 = vcmask 589312   ;;  %v1298_v15 = vsel %vm1297_vm1, %v1296_v1, %v1294_v52 }
 0x1dc   :  { %v1337_v49 = vsel %vm1281_vm5, %v1336_v57, %v1335_v46  ;;  %v1302_v24 = vsel %vm1301_vm2, %v1300_v50, %v1298_v15 }
 0x1dd   :  { %v1306_v11 = vsel %vm1305_vm9, %v1304_v13, %v1302_v24 }
 0x1de   :  { %v1310_v3 = vsel %vm1309_vm10, %v1308_v9, %v1306_v11 }
 0x1df   :  { %v1240_v53 = vpop.permute.xlu2 %1239 }
 0x1e0   :  { %v1342_v21 = vperm.slane %v1240_v53, %v1291_v43  ;;  %v1324_v53 = vperm.slane %v2544_v38, %v1323_v32 }
 0x1e5   :  { %v1237_v35 = vpop.permute.xlu0 %1236 }
 0x1e6   :  { %v1340_v22 = vperm.slane %v1237_v35, %v1287_v33  ;;  %v1327_v33 = vadd.s32 4294967176, %v2503_v42 }
 0x1e7   :  { %v1234_v54 = vpop.permute.xlu1 %1233 }
 0x1e8   :  { %v1338_v26 = vperm.slane %v1234_v54, %v1283_v34  ;;  %v1314_v54 = vsel %vm1313_vm11, %v1312_v27, %v1310_v3  ;;  %v1328_v47 = vperm.slane %v2546_v5, %v1327_v33 }
 0x1e9   :  { %v1318_v34 = vsel %vm1317_vm12, %v1316_v31, %v1314_v54 }
 0x1ea   :  { %v1339_v20 = vsel %vm1285_vm6, %v1338_v26, %v1337_v49  ;;  %v1322_v43 = vsel %vm1321_vm13, %v1320_v28, %v1318_v34 }
 0x1eb   :  { %v1341_v14 = vsel %vm1289_vm7, %v1340_v22, %v1339_v20  ;;  %v1326_v42 = vsel %vm1325_vm14, %v1324_v53, %v1322_v43 }
 0x1ec   :  { %v1343_v63 = vsel %vm1293_vm8, %v1342_v21, %v1341_v14  ;;  %v1330_v46 = vsel %vm1329_vm15, %v1328_v47, %v1326_v42 }
 0x1ef   :  { %v1243_v41 = vpop.permute.xlu1 %1242  ;;  %v1249_v62 = vpop.permute.xlu2 %1248 }
 0x1f0   :  { %v1344_v60 = vperm.slane %v1243_v41, %v1295_v37  ;;  %v1348_v25 = vperm.slane %v1249_v62, %v1303_v2 }
 0x1f2   :  { %v1345_v30 = vsel %vm1297_vm1, %v1344_v60, %v1343_v63 }
 0x1f5   :  { %v1246_v59 = vpop.permute.xlu0 %1245 }
 0x1f6   :  { %v1346_v51 = vperm.slane %v1246_v59, %v1299_v17 }
 0x1f7   :  { %v1258_v23 = vpop.permute.xlu2 %1257 }
 0x1f8   :  { %v1347_v55 = vsel %vm1301_vm2, %v1346_v51, %v1345_v30  ;;  %v1354_v35 = vperm.slane %v1258_v23, %v1315_v12 }
 0x1f9   :  { %v1349_v56 = vsel %vm1305_vm9, %v1348_v25, %v1347_v55 }
 0x205   :  { %v1252_v29 = vpop.permute.xlu1 %1251 }
 0x206   :  { %v1350_v18 = vperm.slane %v1252_v29, %v1307_v58 }
 0x208   :  { %v1351_v6 = vsel %vm1309_vm10, %v1350_v18, %v1349_v56 }
 0x20d   :  { %v1267_v39 = vpop.permute.xlu2 %1266 }
 0x20e   :  { %v1360_v19 = vperm.slane %v1267_v39, %v1327_v33 }
 0x215   :  { %v1261_v36 = vpop.permute.xlu1 %1260 }
 0x216   :  { %v1356_v40 = vperm.slane %v1261_v36, %v1319_v44 }
 0x217   :  { %v1255_v7 = vpop.permute.xlu0 %1254 }
 0x218   :  { %v1352_v4 = vperm.slane %v1255_v7, %v1311_v8 }
 0x21a   :  { %v1353_v48 = vsel %vm1313_vm11, %v1352_v4, %v1351_v6 }
 0x21b   :  { %v1355_v10 = vsel %vm1317_vm12, %v1354_v35, %v1353_v48 }
 0x21c   :  { %v1357_v38 = vsel %vm1321_vm13, %v1356_v40, %v1355_v10 }
 0x227   :  { %v1264_v0 = vpop.permute.xlu0 %1263 }
 0x228   :  { %v1358_v61 = vperm.slane %v1264_v0, %v1323_v32 }
 0x22a   :  { %v1359_v17 = vsel %vm1325_vm14, %v1358_v61, %v1357_v38 }
 0x22b   :  { %v1361_v5 = vsel %vm1329_vm15, %v1360_v19, %v1359_v17 }
 0x22c   :  { %v1363_v26 = vsel %vm1362_vm0, %v1361_v5, %v1330_v46 }
 0x22d   :  { %1365 = vst [vmem:[#allocation2] sm:$0x3] %v1363_v26 }
 0x22e   :  { %1376 = dma.vmem_to_hbm [thread:$0]  %s1372_s22, 32, %s1374_s25, [#allocation3]  }
 0x22f   :  { %1729 = dma.done.wait [#allocation3], 32  }
 0x230   :  { %1730 = vsyncadd [#allocation3], 4294967264 }
 0x231   :  { %1381 = vsyncpa [#allocation3], 1 }

</bundles_post_ra>
